<compile_context>
chip_gen: v6e
topology: v6e:2x2x1
jax: 0.10.0
libtpu: 0.0.40
codegen_flags: <defaults>
</compile_context>

<pallas_src>
import functools

import jax
import jax.numpy as jnp
from jax import lax
from jax.experimental import pallas as pl
from jax.experimental.pallas import tpu as pltpu


def _round_up(x, m):
    return (x + m - 1) // m * m


def _lstm_chunk_kernel(x_ref, w_ih_ref, w_hh_ref, b_ref, w_out_ref, b_out_ref,
                       y_ref, h_scr, c_scr, gx_scr, hall_scr):
    """One grid step == one chunk of T_chunk LSTM time steps.

    Refs (per grid step):
      x_ref    : (T_chunk*B_pad, E)        time-major input rows of this chunk
      w_ih_ref : (E, 4*H_pad)              input->gates weights (gate order i,f,g,o)
      w_hh_ref : (H_pad, 4*H_pad)          hidden->gates weights
      b_ref    : (1, 4*H_pad)              combined bias (b_ih + b_hh)
      w_out_ref: (1, H_pad)                hidden2outputs weight (row vector)
      b_out_ref: (1, 1)                    hidden2outputs bias
      y_ref    : (T_chunk, B_pad)          sigmoid(logit) for each (t, b) of the chunk
      h_scr    : (B_pad, H_pad)            hidden state carried across chunks
      c_scr    : (B_pad, H_pad)            cell   state carried across chunks
      gx_scr   : (T_chunk*B_pad, 4*H_pad)  precomputed x@W_ih + b for the chunk
      hall_scr : (T_chunk, B_pad, H_pad)   hidden states of the chunk (for the
                                           batched output projection)
    """
    b_pad, h_pad = h_scr.shape
    t_chunk = hall_scr.shape[0]

    @pl.when(pl.program_id(0) == 0)
    def _():
        # PyTorch uses zero h0/c0 when no hidden state is passed to self.rnn(x).
        h_scr[...] = jnp.zeros_like(h_scr)
        c_scr[...] = jnp.zeros_like(c_scr)

    # Hoisted input projection for the whole chunk: one MXU matmul with
    # M = T_chunk * B_pad instead of T_chunk sliver matmuls; bias folded in once.
    gx_scr[...] = (
        jnp.dot(x_ref[...], w_ih_ref[...], preferred_element_type=jnp.float32)
        + b_ref[...]
    )

    def step(t, carry):
        h_prev, c_prev = carry
        row = pl.multiple_of(t * b_pad, b_pad)
        gates = gx_scr[pl.ds(row, b_pad), :] + jnp.dot(
            h_prev, w_hh_ref[...], preferred_element_type=jnp.float32)
        # Gate slices are 128-lane aligned because H is padded to a multiple of 128.
        i_g = jax.nn.sigmoid(gates[:, 0 * h_pad:1 * h_pad])
        f_g = jax.nn.sigmoid(gates[:, 1 * h_pad:2 * h_pad])
        g_g = jnp.tanh(gates[:, 2 * h_pad:3 * h_pad])
        o_g = jax.nn.sigmoid(gates[:, 3 * h_pad:4 * h_pad])
        c_new = f_g * c_prev + i_g * g_g
        h_new = o_g * jnp.tanh(c_new)
        hall_scr[t] = h_new
        return (h_new, c_new)

    unroll = t_chunk if t_chunk <= 16 else 8
    h_fin, c_fin = lax.fori_loop(0, t_chunk, step, (h_scr[...], c_scr[...]),
                                 unroll=unroll)
    h_scr[...] = h_fin
    c_scr[...] = c_fin

    # Batched output projection for the whole chunk: VPU multiply + lane reduce
    # (an N=1 MXU matmul would waste the result columns), then one store per
    # chunk.  Dropout is identity at p=0.0.
    logits = jnp.sum(hall_scr[...] * w_out_ref[...], axis=-1) + b_out_ref[...]
    y_ref[...] = jax.nn.sigmoid(logits)


@functools.partial(jax.jit, static_argnames=("hidden_dim",))
def verification_rnn_forward(x, w_ih, w_hh, b_ih, b_hh, w_out, b_out, *,
                             hidden_dim):
    """x: (B, T, E) float32.  Returns (B, T, 1) float32."""
    batch, seq_len, emb = x.shape
    hdim = hidden_dim
    f32 = jnp.float32

    b_pad = _round_up(batch, 8)       # sublane multiple
    h_pad = _round_up(hdim, 128)      # lane-aligned gates

    # Time chunking: one chunk for short sequences, 128-step chunks otherwise
    # (keeps the output block's leading dim tile friendly when multi-chunk).
    t_chunk = seq_len if seq_len <= 512 else 128
    t_pad = _round_up(seq_len, t_chunk)
    n_chunks = t_pad // t_chunk

    # --- Input: time-major, batch/time zero-padded, flattened so the chunked
    # input projection is a single 2-D MXU matmul per chunk.
    x_tm = jnp.transpose(x.astype(f32), (1, 0, 2))                     # (T, B, E)
    x_tm = jnp.pad(x_tm, ((0, t_pad - seq_len), (0, b_pad - batch), (0, 0)))
    x_flat = x_tm.reshape(t_pad * b_pad, emb)                          # (T_pad*B_pad, E)

    # --- Weights: PyTorch stores W as (4H, in); reorganize to (in, 4*H_pad)
    # with each gate zero-padded to H_pad so gate slices are lane-aligned.
    w_ih4 = w_ih.astype(f32).reshape(4, hdim, emb)
    w_ih4 = jnp.pad(w_ih4, ((0, 0), (0, h_pad - hdim), (0, 0)))
    w_ih_t = jnp.transpose(w_ih4, (2, 0, 1)).reshape(emb, 4 * h_pad)

    w_hh4 = w_hh.astype(f32).reshape(4, hdim, hdim)
    w_hh4 = jnp.pad(w_hh4, ((0, 0), (0, h_pad - hdim), (0, h_pad - hdim)))
    w_hh_t = jnp.transpose(w_hh4, (2, 0, 1)).reshape(h_pad, 4 * h_pad)

    b4 = (b_ih + b_hh).astype(f32).reshape(4, hdim)
    b4 = jnp.pad(b4, ((0, 0), (0, h_pad - hdim)))
    b_comb = b4.reshape(1, 4 * h_pad)

    w_out_r = jnp.pad(w_out.astype(f32), ((0, 0), (0, h_pad - hdim)))  # (1, H_pad)
    b_out_r = b_out.astype(f32).reshape(1, 1)

    y_tm = pl.pallas_call(
        _lstm_chunk_kernel,
        out_shape=jax.ShapeDtypeStruct((t_pad, b_pad), jnp.float32),
        grid_spec=pltpu.PrefetchScalarGridSpec(
            num_scalar_prefetch=0,
            grid=(n_chunks,),
            in_specs=[
                pl.BlockSpec((t_chunk * b_pad, emb), lambda c: (c, 0)),
                # These constant-index weight blocks could take
                # pipeline_mode=pl.Buffered(1) at large hidden_dim to avoid
                # double-buffered weight VMEM; negligible at these sizes.
                pl.BlockSpec((emb, 4 * h_pad), lambda c: (0, 0)),
                pl.BlockSpec((h_pad, 4 * h_pad), lambda c: (0, 0)),
                pl.BlockSpec((1, 4 * h_pad), lambda c: (0, 0)),
                pl.BlockSpec((1, h_pad), lambda c: (0, 0)),
                pl.BlockSpec((1, 1), lambda c: (0, 0)),
            ],
            out_specs=pl.BlockSpec((t_chunk, b_pad), lambda c: (c, 0)),
            scratch_shapes=[
                pltpu.VMEM((b_pad, h_pad), jnp.float32),                # h carry
                pltpu.VMEM((b_pad, h_pad), jnp.float32),                # c carry
                pltpu.VMEM((t_chunk * b_pad, 4 * h_pad), jnp.float32),  # x-proj gates
                pltpu.VMEM((t_chunk, b_pad, h_pad), jnp.float32),       # chunk hiddens
            ],
        ),
        compiler_params=pltpu.CompilerParams(
            dimension_semantics=("arbitrary",),   # chunks carry the recurrence
        ),
    )(x_flat, w_ih_t, w_hh_t, b_comb, w_out_r, b_out_r)

    # (T_pad, B_pad) -> (B, T, 1); the transposed array is tiny (no H/E dim).
    y = jnp.transpose(y_tm)[:batch, :seq_len]
    return y[..., None]


def _reference_forward(x, w_ih, w_hh, b_ih, b_hh, w_out, b_out, hidden_dim):
    """Pure-JAX reference of the same forward pass (lax.scan LSTM)."""
    batch = x.shape[0]
    hdim = hidden_dim
    w_ih_t = w_ih.T
    w_hh_t = w_hh.T
    b = b_ih + b_hh

    def step(carry, x_t):
        h, c = carry
        gates = x_t @ w_ih_t + h @ w_hh_t + b
        i = jax.nn.sigmoid(gates[:, 0 * hdim:1 * hdim])
        f = jax.nn.sigmoid(gates[:, 1 * hdim:2 * hdim])
        g = jnp.tanh(gates[:, 2 * hdim:3 * hdim])
        o = jax.nn.sigmoid(gates[:, 3 * hdim:4 * hdim])
        c = f * c + i * g
        h = o * jnp.tanh(c)
        return (h, c), h

    h0 = jnp.zeros((batch, hdim), jnp.float32)
    c0 = jnp.zeros((batch, hdim), jnp.float32)
    _, hs = lax.scan(step, (h0, c0), jnp.transpose(x, (1, 0, 2)))
    hs = jnp.transpose(hs, (1, 0, 2))               # (B, T, H)
    return jax.nn.sigmoid(hs @ w_out.T + b_out)     # (B, T, 1)


if __name__ == "__main__":
    # Small synthetic configuration consistent with the module defaults.
    batch, seq_len, embedding_dim, hidden_dim = 4, 8, 16, 32

    key = jax.random.PRNGKey(0)
    kx, k1, k2, k3, k4, k5, k6 = jax.random.split(key, 7)

    x = jax.random.normal(kx, (batch, seq_len, embedding_dim), jnp.float32)

    # Deterministic parameter init (PyTorch LSTM / Linear parameter shapes).
    s = 0.1
    w_ih = s * jax.random.normal(k1, (4 * hidden_dim, embedding_dim), jnp.float32)
    w_hh = s * jax.random.normal(k2, (4 * hidden_dim, hidden_dim), jnp.float32)
    b_ih = s * jax.random.normal(k3, (4 * hidden_dim,), jnp.float32)
    b_hh = s * jax.random.normal(k4, (4 * hidden_dim,), jnp.float32)
    w_out = s * jax.random.normal(k5, (1, hidden_dim), jnp.float32)
    b_out = s * jax.random.normal(k6, (1,), jnp.float32)

    y = verification_rnn_forward(x, w_ih, w_hh, b_ih, b_hh, w_out, b_out,
                                 hidden_dim=hidden_dim)
    y = jax.block_until_ready(y)

    y_ref = _reference_forward(x, w_ih, w_hh, b_ih, b_hh, w_out, b_out,
                               hidden_dim)
    assert y.shape == (batch, seq_len, 1)
    assert jnp.allclose(y, y_ref, atol=2e-5, rtol=2e-5), (
        f"mismatch: max abs err {jnp.max(jnp.abs(y - y_ref))}")

    print("KERNEL_OK")
</pallas_src>

<mosaic_0001>
module attributes {stable_mosaic.version = 11 : i64} {
  func.func @_lstm_chunk_kernel(%arg0: i32, %arg1: memref<64x16xf32, #tpu.memory_space<vmem>>, %arg2: memref<16x512xf32, #tpu.memory_space<vmem>>, %arg3: memref<128x512xf32, #tpu.memory_space<vmem>>, %arg4: memref<1x512xf32, #tpu.memory_space<vmem>>, %arg5: memref<1x128xf32, #tpu.memory_space<vmem>>, %arg6: memref<1x1xf32, #tpu.memory_space<vmem>>, %arg7: memref<8x8xf32, #tpu.memory_space<vmem>>, %arg8: memref<8x128xf32, #tpu.memory_space<vmem>>, %arg9: memref<8x128xf32, #tpu.memory_space<vmem>>, %arg10: memref<64x512xf32, #tpu.memory_space<vmem>>, %arg11: memref<8x8x128xf32, #tpu.memory_space<vmem>>) attributes {dimension_semantics = [#tpu.dimension_semantics<arbitrary>], iteration_bounds = array<i64: 1>, scalar_prefetch = 0 : i64, scratch_operands = 4 : i64, tpu.core_type = #tpu.core_type<tc>, window_params = [{transform_indices = @transform_0, window_bounds = array<i64: 64, 16>}, {pipeline_mode = #tpu.pipeline_mode<synchronous>, transform_indices = @transform_1, window_bounds = array<i64: 16, 512>}, {pipeline_mode = #tpu.pipeline_mode<synchronous>, transform_indices = @transform_2, window_bounds = array<i64: 128, 512>}, {pipeline_mode = #tpu.pipeline_mode<synchronous>, transform_indices = @transform_3, window_bounds = array<i64: 1, 512>}, {pipeline_mode = #tpu.pipeline_mode<synchronous>, transform_indices = @transform_4, window_bounds = array<i64: 1, 128>}, {pipeline_mode = #tpu.pipeline_mode<synchronous>, transform_indices = @transform_5, window_bounds = array<i64: 1, 1>}, {transform_indices = @transform_6, window_bounds = array<i64: 8, 8>}]} {
    %c0_i32 = arith.constant 0 : i32
    %0 = arith.cmpi eq, %arg0, %c0_i32 : i32
    %1 = arith.extui %0 : i1 to i32
    %c0_i32_0 = arith.constant 0 : i32
    %2 = arith.cmpi ne, %1, %c0_i32_0 : i32
    scf.if %2 {
      %cst_108 = arith.constant 0.000000e+00 : f32
      %317 = vector.broadcast %cst_108 : f32 to vector<8x128xf32>
      %c0_109 = arith.constant 0 : index
      %c0_110 = arith.constant 0 : index
      %318 = vector.load %arg8[%c0_109, %c0_110] : memref<8x128xf32, #tpu.memory_space<vmem>>, vector<8x128xf32>
      tpu.vector_store %arg8[%c0_109, %c0_110], %317 {strides = array<i32>} : memref<8x128xf32, #tpu.memory_space<vmem>>, vector<8x128xf32>,
      %cst_111 = arith.constant 0.000000e+00 : f32
      %319 = vector.broadcast %cst_111 : f32 to vector<8x128xf32>
      %c0_112 = arith.constant 0 : index
      %c0_113 = arith.constant 0 : index
      %320 = vector.load %arg9[%c0_112, %c0_113] : memref<8x128xf32, #tpu.memory_space<vmem>>, vector<8x128xf32>
      tpu.vector_store %arg9[%c0_112, %c0_113], %319 {strides = array<i32>} : memref<8x128xf32, #tpu.memory_space<vmem>>, vector<8x128xf32>,
    } else {
    }
    %c0 = arith.constant 0 : index
    %c0_1 = arith.constant 0 : index
    %3 = vector.load %arg1[%c0, %c0_1] : memref<64x16xf32, #tpu.memory_space<vmem>>, vector<64x16xf32>
    %c0_2 = arith.constant 0 : index
    %c0_3 = arith.constant 0 : index
    %4 = vector.load %arg2[%c0_2, %c0_3] : memref<16x512xf32, #tpu.memory_space<vmem>>, vector<16x512xf32>
    %cst = arith.constant dense<0.000000e+00> : vector<64x512xf32>
    %5 = tpu.matmul %3, %4, %cst {dimension_numbers = #tpu.dot_dimension_numbers<[1], [0], [0], [1], [0, 0, 1, 1], [], []>} : vector<64x16xf32>, vector<16x512xf32>, vector<64x512xf32> -> vector<64x512xf32>
    %c0_4 = arith.constant 0 : index
    %c0_5 = arith.constant 0 : index
    %6 = vector.load %arg4[%c0_4, %c0_5] : memref<1x512xf32, #tpu.memory_space<vmem>>, vector<1x512xf32>
    %7 = vector.broadcast %6 : vector<1x512xf32> to vector<64x512xf32>
    %8 = arith.addf %5, %7 : vector<64x512xf32>
    %c0_6 = arith.constant 0 : index
    %c0_7 = arith.constant 0 : index
    %9 = vector.load %arg10[%c0_6, %c0_7] : memref<64x512xf32, #tpu.memory_space<vmem>>, vector<64x512xf32>
    tpu.vector_store %arg10[%c0_6, %c0_7], %8 {strides = array<i32>} : memref<64x512xf32, #tpu.memory_space<vmem>>, vector<64x512xf32>,
    %c0_8 = arith.constant 0 : index
    %c0_9 = arith.constant 0 : index
    %10 = vector.load %arg8[%c0_8, %c0_9] : memref<8x128xf32, #tpu.memory_space<vmem>>, vector<8x128xf32>
    %c0_10 = arith.constant 0 : index
    %c0_11 = arith.constant 0 : index
    %11 = vector.load %arg9[%c0_10, %c0_11] : memref<8x128xf32, #tpu.memory_space<vmem>>, vector<8x128xf32>
    %c0_i32_12 = arith.constant 0 : i32
    %c8_i32 = arith.constant 8 : i32
    %12 = arith.muli %c0_i32_12, %c8_i32 : i32
    %13 = tpu.assume_multiple %12, 8 : i32
    %14 = arith.index_cast %13 : i32 to index
    %c0_13 = arith.constant 0 : index
    %15 = vector.load %arg10[%14, %c0_13] : memref<64x512xf32, #tpu.memory_space<vmem>>, vector<8x512xf32>
    %c0_14 = arith.constant 0 : index
    %c0_15 = arith.constant 0 : index
    %16 = vector.load %arg3[%c0_14, %c0_15] : memref<128x512xf32, #tpu.memory_space<vmem>>, vector<128x512xf32>
    %cst_16 = arith.constant dense<0.000000e+00> : vector<8x512xf32>
    %17 = tpu.matmul %10, %16, %cst_16 {dimension_numbers = #tpu.dot_dimension_numbers<[1], [0], [0], [1], [0, 0, 1, 1], [], []>} : vector<8x128xf32>, vector<128x512xf32>, vector<8x512xf32> -> vector<8x512xf32>
    %18 = arith.addf %15, %17 : vector<8x512xf32>
    %19 = vector.extract_strided_slice %18 {offsets = [0, 0], sizes = [8, 128], strides = [1, 1]} : vector<8x512xf32> to vector<8x128xf32>
    %20 = arith.negf %19 : vector<8x128xf32>
    %21 = math.exp %20 : vector<8x128xf32>
    %cst_17 = arith.constant 1.000000e+00 : f32
    %22 = vector.broadcast %cst_17 : f32 to vector<8x128xf32>
    %23 = arith.addf %22, %21 : vector<8x128xf32>
    %24 = arith.divf %22, %23 : vector<8x128xf32>
    %25 = vector.extract_strided_slice %18 {offsets = [0, 128], sizes = [8, 128], strides = [1, 1]} : vector<8x512xf32> to vector<8x128xf32>
    %26 = arith.negf %25 : vector<8x128xf32>
    %27 = math.exp %26 : vector<8x128xf32>
    %cst_18 = arith.constant 1.000000e+00 : f32
    %28 = vector.broadcast %cst_18 : f32 to vector<8x128xf32>
    %29 = arith.addf %28, %27 : vector<8x128xf32>
    %30 = arith.divf %28, %29 : vector<8x128xf32>
    %31 = vector.extract_strided_slice %18 {offsets = [0, 256], sizes = [8, 128], strides = [1, 1]} : vector<8x512xf32> to vector<8x128xf32>
    %32 = math.tanh %31 : vector<8x128xf32>
    %33 = vector.extract_strided_slice %18 {offsets = [0, 384], sizes = [8, 128], strides = [1, 1]} : vector<8x512xf32> to vector<8x128xf32>
    %34 = arith.negf %33 : vector<8x128xf32>
    %35 = math.exp %34 : vector<8x128xf32>
    %cst_19 = arith.constant 1.000000e+00 : f32
    %36 = vector.broadcast %cst_19 : f32 to vector<8x128xf32>
    %37 = arith.addf %36, %35 : vector<8x128xf32>
    %38 = arith.divf %36, %37 : vector<8x128xf32>
    %39 = arith.mulf %30, %11 : vector<8x128xf32>
    %40 = arith.mulf %24, %32 : vector<8x128xf32>
    %41 = arith.addf %39, %40 : vector<8x128xf32>
    %42 = math.tanh %41 : vector<8x128xf32>
    %43 = arith.mulf %38, %42 : vector<8x128xf32>
    %44 = arith.index_cast %c0_i32_12 : i32 to index
    %c0_20 = arith.constant 0 : index
    %c0_21 = arith.constant 0 : index
    %45 = vector.load %arg11[%44, %c0_20, %c0_21] : memref<8x8x128xf32, #tpu.memory_space<vmem>>, vector<1x8x128xf32>
    %46 = vector.shape_cast %45 : vector<1x8x128xf32> to vector<8x128xf32>
    %47 = vector.shape_cast %43 : vector<8x128xf32> to vector<1x8x128xf32>
    tpu.vector_store %arg11[%44, %c0_20, %c0_21], %47 {strides = array<i32>} : memref<8x8x128xf32, #tpu.memory_space<vmem>>, vector<1x8x128xf32>,
    %c1_i32 = arith.constant 1 : i32
    %c8_i32_22 = arith.constant 8 : i32
    %48 = arith.muli %c1_i32, %c8_i32_22 : i32
    %49 = tpu.assume_multiple %48, 8 : i32
    %50 = arith.index_cast %49 : i32 to index
    %c0_23 = arith.constant 0 : index
    %51 = vector.load %arg10[%50, %c0_23] : memref<64x512xf32, #tpu.memory_space<vmem>>, vector<8x512xf32>
    %c0_24 = arith.constant 0 : index
    %c0_25 = arith.constant 0 : index
    %52 = vector.load %arg3[%c0_24, %c0_25] : memref<128x512xf32, #tpu.memory_space<vmem>>, vector<128x512xf32>
    %cst_26 = arith.constant dense<0.000000e+00> : vector<8x512xf32>
    %53 = tpu.matmul %43, %52, %cst_26 {dimension_numbers = #tpu.dot_dimension_numbers<[1], [0], [0], [1], [0, 0, 1, 1], [], []>} : vector<8x128xf32>, vector<128x512xf32>, vector<8x512xf32> -> vector<8x512xf32>
    %54 = arith.addf %51, %53 : vector<8x512xf32>
    %55 = vector.extract_strided_slice %54 {offsets = [0, 0], sizes = [8, 128], strides = [1, 1]} : vector<8x512xf32> to vector<8x128xf32>
    %56 = arith.negf %55 : vector<8x128xf32>
    %57 = math.exp %56 : vector<8x128xf32>
    %cst_27 = arith.constant 1.000000e+00 : f32
    %58 = vector.broadcast %cst_27 : f32 to vector<8x128xf32>
    %59 = arith.addf %58, %57 : vector<8x128xf32>
    %60 = arith.divf %58, %59 : vector<8x128xf32>
    %61 = vector.extract_strided_slice %54 {offsets = [0, 128], sizes = [8, 128], strides = [1, 1]} : vector<8x512xf32> to vector<8x128xf32>
    %62 = arith.negf %61 : vector<8x128xf32>
    %63 = math.exp %62 : vector<8x128xf32>
    %cst_28 = arith.constant 1.000000e+00 : f32
    %64 = vector.broadcast %cst_28 : f32 to vector<8x128xf32>
    %65 = arith.addf %64, %63 : vector<8x128xf32>
    %66 = arith.divf %64, %65 : vector<8x128xf32>
    %67 = vector.extract_strided_slice %54 {offsets = [0, 256], sizes = [8, 128], strides = [1, 1]} : vector<8x512xf32> to vector<8x128xf32>
    %68 = math.tanh %67 : vector<8x128xf32>
    %69 = vector.extract_strided_slice %54 {offsets = [0, 384], sizes = [8, 128], strides = [1, 1]} : vector<8x512xf32> to vector<8x128xf32>
    %70 = arith.negf %69 : vector<8x128xf32>
    %71 = math.exp %70 : vector<8x128xf32>
    %cst_29 = arith.constant 1.000000e+00 : f32
    %72 = vector.broadcast %cst_29 : f32 to vector<8x128xf32>
    %73 = arith.addf %72, %71 : vector<8x128xf32>
    %74 = arith.divf %72, %73 : vector<8x128xf32>
    %75 = arith.mulf %66, %41 : vector<8x128xf32>
    %76 = arith.mulf %60, %68 : vector<8x128xf32>
    %77 = arith.addf %75, %76 : vector<8x128xf32>
    %78 = math.tanh %77 : vector<8x128xf32>
    %79 = arith.mulf %74, %78 : vector<8x128xf32>
    %80 = arith.index_cast %c1_i32 : i32 to index
    %c0_30 = arith.constant 0 : index
    %c0_31 = arith.constant 0 : index
    %81 = vector.load %arg11[%80, %c0_30, %c0_31] : memref<8x8x128xf32, #tpu.memory_space<vmem>>, vector<1x8x128xf32>
    %82 = vector.shape_cast %81 : vector<1x8x128xf32> to vector<8x128xf32>
    %83 = vector.shape_cast %79 : vector<8x128xf32> to vector<1x8x128xf32>
    tpu.vector_store %arg11[%80, %c0_30, %c0_31], %83 {strides = array<i32>} : memref<8x8x128xf32, #tpu.memory_space<vmem>>, vector<1x8x128xf32>,
    %c2_i32 = arith.constant 2 : i32
    %c8_i32_32 = arith.constant 8 : i32
    %84 = arith.muli %c2_i32, %c8_i32_32 : i32
    %85 = tpu.assume_multiple %84, 8 : i32
    %86 = arith.index_cast %85 : i32 to index
    %c0_33 = arith.constant 0 : index
    %87 = vector.load %arg10[%86, %c0_33] : memref<64x512xf32, #tpu.memory_space<vmem>>, vector<8x512xf32>
    %c0_34 = arith.constant 0 : index
    %c0_35 = arith.constant 0 : index
    %88 = vector.load %arg3[%c0_34, %c0_35] : memref<128x512xf32, #tpu.memory_space<vmem>>, vector<128x512xf32>
    %cst_36 = arith.constant dense<0.000000e+00> : vector<8x512xf32>
    %89 = tpu.matmul %79, %88, %cst_36 {dimension_numbers = #tpu.dot_dimension_numbers<[1], [0], [0], [1], [0, 0, 1, 1], [], []>} : vector<8x128xf32>, vector<128x512xf32>, vector<8x512xf32> -> vector<8x512xf32>
    %90 = arith.addf %87, %89 : vector<8x512xf32>
    %91 = vector.extract_strided_slice %90 {offsets = [0, 0], sizes = [8, 128], strides = [1, 1]} : vector<8x512xf32> to vector<8x128xf32>
    %92 = arith.negf %91 : vector<8x128xf32>
    %93 = math.exp %92 : vector<8x128xf32>
    %cst_37 = arith.constant 1.000000e+00 : f32
    %94 = vector.broadcast %cst_37 : f32 to vector<8x128xf32>
    %95 = arith.addf %94, %93 : vector<8x128xf32>
    %96 = arith.divf %94, %95 : vector<8x128xf32>
    %97 = vector.extract_strided_slice %90 {offsets = [0, 128], sizes = [8, 128], strides = [1, 1]} : vector<8x512xf32> to vector<8x128xf32>
    %98 = arith.negf %97 : vector<8x128xf32>
    %99 = math.exp %98 : vector<8x128xf32>
    %cst_38 = arith.constant 1.000000e+00 : f32
    %100 = vector.broadcast %cst_38 : f32 to vector<8x128xf32>
    %101 = arith.addf %100, %99 : vector<8x128xf32>
    %102 = arith.divf %100, %101 : vector<8x128xf32>
    %103 = vector.extract_strided_slice %90 {offsets = [0, 256], sizes = [8, 128], strides = [1, 1]} : vector<8x512xf32> to vector<8x128xf32>
    %104 = math.tanh %103 : vector<8x128xf32>
    %105 = vector.extract_strided_slice %90 {offsets = [0, 384], sizes = [8, 128], strides = [1, 1]} : vector<8x512xf32> to vector<8x128xf32>
    %106 = arith.negf %105 : vector<8x128xf32>
    %107 = math.exp %106 : vector<8x128xf32>
    %cst_39 = arith.constant 1.000000e+00 : f32
    %108 = vector.broadcast %cst_39 : f32 to vector<8x128xf32>
    %109 = arith.addf %108, %107 : vector<8x128xf32>
    %110 = arith.divf %108, %109 : vector<8x128xf32>
    %111 = arith.mulf %102, %77 : vector<8x128xf32>
    %112 = arith.mulf %96, %104 : vector<8x128xf32>
    %113 = arith.addf %111, %112 : vector<8x128xf32>
    %114 = math.tanh %113 : vector<8x128xf32>
    %115 = arith.mulf %110, %114 : vector<8x128xf32>
    %116 = arith.index_cast %c2_i32 : i32 to index
    %c0_40 = arith.constant 0 : index
    %c0_41 = arith.constant 0 : index
    %117 = vector.load %arg11[%116, %c0_40, %c0_41] : memref<8x8x128xf32, #tpu.memory_space<vmem>>, vector<1x8x128xf32>
    %118 = vector.shape_cast %117 : vector<1x8x128xf32> to vector<8x128xf32>
    %119 = vector.shape_cast %115 : vector<8x128xf32> to vector<1x8x128xf32>
    tpu.vector_store %arg11[%116, %c0_40, %c0_41], %119 {strides = array<i32>} : memref<8x8x128xf32, #tpu.memory_space<vmem>>, vector<1x8x128xf32>,
    %c3_i32 = arith.constant 3 : i32
    %c8_i32_42 = arith.constant 8 : i32
    %120 = arith.muli %c3_i32, %c8_i32_42 : i32
    %121 = tpu.assume_multiple %120, 8 : i32
    %122 = arith.index_cast %121 : i32 to index
    %c0_43 = arith.constant 0 : index
    %123 = vector.load %arg10[%122, %c0_43] : memref<64x512xf32, #tpu.memory_space<vmem>>, vector<8x512xf32>
    %c0_44 = arith.constant 0 : index
    %c0_45 = arith.constant 0 : index
    %124 = vector.load %arg3[%c0_44, %c0_45] : memref<128x512xf32, #tpu.memory_space<vmem>>, vector<128x512xf32>
    %cst_46 = arith.constant dense<0.000000e+00> : vector<8x512xf32>
    %125 = tpu.matmul %115, %124, %cst_46 {dimension_numbers = #tpu.dot_dimension_numbers<[1], [0], [0], [1], [0, 0, 1, 1], [], []>} : vector<8x128xf32>, vector<128x512xf32>, vector<8x512xf32> -> vector<8x512xf32>
    %126 = arith.addf %123, %125 : vector<8x512xf32>
    %127 = vector.extract_strided_slice %126 {offsets = [0, 0], sizes = [8, 128], strides = [1, 1]} : vector<8x512xf32> to vector<8x128xf32>
    %128 = arith.negf %127 : vector<8x128xf32>
    %129 = math.exp %128 : vector<8x128xf32>
    %cst_47 = arith.constant 1.000000e+00 : f32
    %130 = vector.broadcast %cst_47 : f32 to vector<8x128xf32>
    %131 = arith.addf %130, %129 : vector<8x128xf32>
    %132 = arith.divf %130, %131 : vector<8x128xf32>
    %133 = vector.extract_strided_slice %126 {offsets = [0, 128], sizes = [8, 128], strides = [1, 1]} : vector<8x512xf32> to vector<8x128xf32>
    %134 = arith.negf %133 : vector<8x128xf32>
    %135 = math.exp %134 : vector<8x128xf32>
    %cst_48 = arith.constant 1.000000e+00 : f32
    %136 = vector.broadcast %cst_48 : f32 to vector<8x128xf32>
    %137 = arith.addf %136, %135 : vector<8x128xf32>
    %138 = arith.divf %136, %137 : vector<8x128xf32>
    %139 = vector.extract_strided_slice %126 {offsets = [0, 256], sizes = [8, 128], strides = [1, 1]} : vector<8x512xf32> to vector<8x128xf32>
    %140 = math.tanh %139 : vector<8x128xf32>
    %141 = vector.extract_strided_slice %126 {offsets = [0, 384], sizes = [8, 128], strides = [1, 1]} : vector<8x512xf32> to vector<8x128xf32>
    %142 = arith.negf %141 : vector<8x128xf32>
    %143 = math.exp %142 : vector<8x128xf32>
    %cst_49 = arith.constant 1.000000e+00 : f32
    %144 = vector.broadcast %cst_49 : f32 to vector<8x128xf32>
    %145 = arith.addf %144, %143 : vector<8x128xf32>
    %146 = arith.divf %144, %145 : vector<8x128xf32>
    %147 = arith.mulf %138, %113 : vector<8x128xf32>
    %148 = arith.mulf %132, %140 : vector<8x128xf32>
    %149 = arith.addf %147, %148 : vector<8x128xf32>
    %150 = math.tanh %149 : vector<8x128xf32>
    %151 = arith.mulf %146, %150 : vector<8x128xf32>
    %152 = arith.index_cast %c3_i32 : i32 to index
    %c0_50 = arith.constant 0 : index
    %c0_51 = arith.constant 0 : index
    %153 = vector.load %arg11[%152, %c0_50, %c0_51] : memref<8x8x128xf32, #tpu.memory_space<vmem>>, vector<1x8x128xf32>
    %154 = vector.shape_cast %153 : vector<1x8x128xf32> to vector<8x128xf32>
    %155 = vector.shape_cast %151 : vector<8x128xf32> to vector<1x8x128xf32>
    tpu.vector_store %arg11[%152, %c0_50, %c0_51], %155 {strides = array<i32>} : memref<8x8x128xf32, #tpu.memory_space<vmem>>, vector<1x8x128xf32>,
    %c4_i32 = arith.constant 4 : i32
    %c8_i32_52 = arith.constant 8 : i32
    %156 = arith.muli %c4_i32, %c8_i32_52 : i32
    %157 = tpu.assume_multiple %156, 8 : i32
    %158 = arith.index_cast %157 : i32 to index
    %c0_53 = arith.constant 0 : index
    %159 = vector.load %arg10[%158, %c0_53] : memref<64x512xf32, #tpu.memory_space<vmem>>, vector<8x512xf32>
    %c0_54 = arith.constant 0 : index
    %c0_55 = arith.constant 0 : index
    %160 = vector.load %arg3[%c0_54, %c0_55] : memref<128x512xf32, #tpu.memory_space<vmem>>, vector<128x512xf32>
    %cst_56 = arith.constant dense<0.000000e+00> : vector<8x512xf32>
    %161 = tpu.matmul %151, %160, %cst_56 {dimension_numbers = #tpu.dot_dimension_numbers<[1], [0], [0], [1], [0, 0, 1, 1], [], []>} : vector<8x128xf32>, vector<128x512xf32>, vector<8x512xf32> -> vector<8x512xf32>
    %162 = arith.addf %159, %161 : vector<8x512xf32>
    %163 = vector.extract_strided_slice %162 {offsets = [0, 0], sizes = [8, 128], strides = [1, 1]} : vector<8x512xf32> to vector<8x128xf32>
    %164 = arith.negf %163 : vector<8x128xf32>
    %165 = math.exp %164 : vector<8x128xf32>
    %cst_57 = arith.constant 1.000000e+00 : f32
    %166 = vector.broadcast %cst_57 : f32 to vector<8x128xf32>
    %167 = arith.addf %166, %165 : vector<8x128xf32>
    %168 = arith.divf %166, %167 : vector<8x128xf32>
    %169 = vector.extract_strided_slice %162 {offsets = [0, 128], sizes = [8, 128], strides = [1, 1]} : vector<8x512xf32> to vector<8x128xf32>
    %170 = arith.negf %169 : vector<8x128xf32>
    %171 = math.exp %170 : vector<8x128xf32>
    %cst_58 = arith.constant 1.000000e+00 : f32
    %172 = vector.broadcast %cst_58 : f32 to vector<8x128xf32>
    %173 = arith.addf %172, %171 : vector<8x128xf32>
    %174 = arith.divf %172, %173 : vector<8x128xf32>
    %175 = vector.extract_strided_slice %162 {offsets = [0, 256], sizes = [8, 128], strides = [1, 1]} : vector<8x512xf32> to vector<8x128xf32>
    %176 = math.tanh %175 : vector<8x128xf32>
    %177 = vector.extract_strided_slice %162 {offsets = [0, 384], sizes = [8, 128], strides = [1, 1]} : vector<8x512xf32> to vector<8x128xf32>
    %178 = arith.negf %177 : vector<8x128xf32>
    %179 = math.exp %178 : vector<8x128xf32>
    %cst_59 = arith.constant 1.000000e+00 : f32
    %180 = vector.broadcast %cst_59 : f32 to vector<8x128xf32>
    %181 = arith.addf %180, %179 : vector<8x128xf32>
    %182 = arith.divf %180, %181 : vector<8x128xf32>
    %183 = arith.mulf %174, %149 : vector<8x128xf32>
    %184 = arith.mulf %168, %176 : vector<8x128xf32>
    %185 = arith.addf %183, %184 : vector<8x128xf32>
    %186 = math.tanh %185 : vector<8x128xf32>
    %187 = arith.mulf %182, %186 : vector<8x128xf32>
    %188 = arith.index_cast %c4_i32 : i32 to index
    %c0_60 = arith.constant 0 : index
    %c0_61 = arith.constant 0 : index
    %189 = vector.load %arg11[%188, %c0_60, %c0_61] : memref<8x8x128xf32, #tpu.memory_space<vmem>>, vector<1x8x128xf32>
    %190 = vector.shape_cast %189 : vector<1x8x128xf32> to vector<8x128xf32>
    %191 = vector.shape_cast %187 : vector<8x128xf32> to vector<1x8x128xf32>
    tpu.vector_store %arg11[%188, %c0_60, %c0_61], %191 {strides = array<i32>} : memref<8x8x128xf32, #tpu.memory_space<vmem>>, vector<1x8x128xf32>,
    %c5_i32 = arith.constant 5 : i32
    %c8_i32_62 = arith.constant 8 : i32
    %192 = arith.muli %c5_i32, %c8_i32_62 : i32
    %193 = tpu.assume_multiple %192, 8 : i32
    %194 = arith.index_cast %193 : i32 to index
    %c0_63 = arith.constant 0 : index
    %195 = vector.load %arg10[%194, %c0_63] : memref<64x512xf32, #tpu.memory_space<vmem>>, vector<8x512xf32>
    %c0_64 = arith.constant 0 : index
    %c0_65 = arith.constant 0 : index
    %196 = vector.load %arg3[%c0_64, %c0_65] : memref<128x512xf32, #tpu.memory_space<vmem>>, vector<128x512xf32>
    %cst_66 = arith.constant dense<0.000000e+00> : vector<8x512xf32>
    %197 = tpu.matmul %187, %196, %cst_66 {dimension_numbers = #tpu.dot_dimension_numbers<[1], [0], [0], [1], [0, 0, 1, 1], [], []>} : vector<8x128xf32>, vector<128x512xf32>, vector<8x512xf32> -> vector<8x512xf32>
    %198 = arith.addf %195, %197 : vector<8x512xf32>
    %199 = vector.extract_strided_slice %198 {offsets = [0, 0], sizes = [8, 128], strides = [1, 1]} : vector<8x512xf32> to vector<8x128xf32>
    %200 = arith.negf %199 : vector<8x128xf32>
    %201 = math.exp %200 : vector<8x128xf32>
    %cst_67 = arith.constant 1.000000e+00 : f32
    %202 = vector.broadcast %cst_67 : f32 to vector<8x128xf32>
    %203 = arith.addf %202, %201 : vector<8x128xf32>
    %204 = arith.divf %202, %203 : vector<8x128xf32>
    %205 = vector.extract_strided_slice %198 {offsets = [0, 128], sizes = [8, 128], strides = [1, 1]} : vector<8x512xf32> to vector<8x128xf32>
    %206 = arith.negf %205 : vector<8x128xf32>
    %207 = math.exp %206 : vector<8x128xf32>
    %cst_68 = arith.constant 1.000000e+00 : f32
    %208 = vector.broadcast %cst_68 : f32 to vector<8x128xf32>
    %209 = arith.addf %208, %207 : vector<8x128xf32>
    %210 = arith.divf %208, %209 : vector<8x128xf32>
    %211 = vector.extract_strided_slice %198 {offsets = [0, 256], sizes = [8, 128], strides = [1, 1]} : vector<8x512xf32> to vector<8x128xf32>
    %212 = math.tanh %211 : vector<8x128xf32>
    %213 = vector.extract_strided_slice %198 {offsets = [0, 384], sizes = [8, 128], strides = [1, 1]} : vector<8x512xf32> to vector<8x128xf32>
    %214 = arith.negf %213 : vector<8x128xf32>
    %215 = math.exp %214 : vector<8x128xf32>
    %cst_69 = arith.constant 1.000000e+00 : f32
    %216 = vector.broadcast %cst_69 : f32 to vector<8x128xf32>
    %217 = arith.addf %216, %215 : vector<8x128xf32>
    %218 = arith.divf %216, %217 : vector<8x128xf32>
    %219 = arith.mulf %210, %185 : vector<8x128xf32>
    %220 = arith.mulf %204, %212 : vector<8x128xf32>
    %221 = arith.addf %219, %220 : vector<8x128xf32>
    %222 = math.tanh %221 : vector<8x128xf32>
    %223 = arith.mulf %218, %222 : vector<8x128xf32>
    %224 = arith.index_cast %c5_i32 : i32 to index
    %c0_70 = arith.constant 0 : index
    %c0_71 = arith.constant 0 : index
    %225 = vector.load %arg11[%224, %c0_70, %c0_71] : memref<8x8x128xf32, #tpu.memory_space<vmem>>, vector<1x8x128xf32>
    %226 = vector.shape_cast %225 : vector<1x8x128xf32> to vector<8x128xf32>
    %227 = vector.shape_cast %223 : vector<8x128xf32> to vector<1x8x128xf32>
    tpu.vector_store %arg11[%224, %c0_70, %c0_71], %227 {strides = array<i32>} : memref<8x8x128xf32, #tpu.memory_space<vmem>>, vector<1x8x128xf32>,
    %c6_i32 = arith.constant 6 : i32
    %c8_i32_72 = arith.constant 8 : i32
    %228 = arith.muli %c6_i32, %c8_i32_72 : i32
    %229 = tpu.assume_multiple %228, 8 : i32
    %230 = arith.index_cast %229 : i32 to index
    %c0_73 = arith.constant 0 : index
    %231 = vector.load %arg10[%230, %c0_73] : memref<64x512xf32, #tpu.memory_space<vmem>>, vector<8x512xf32>
    %c0_74 = arith.constant 0 : index
    %c0_75 = arith.constant 0 : index
    %232 = vector.load %arg3[%c0_74, %c0_75] : memref<128x512xf32, #tpu.memory_space<vmem>>, vector<128x512xf32>
    %cst_76 = arith.constant dense<0.000000e+00> : vector<8x512xf32>
    %233 = tpu.matmul %223, %232, %cst_76 {dimension_numbers = #tpu.dot_dimension_numbers<[1], [0], [0], [1], [0, 0, 1, 1], [], []>} : vector<8x128xf32>, vector<128x512xf32>, vector<8x512xf32> -> vector<8x512xf32>
    %234 = arith.addf %231, %233 : vector<8x512xf32>
    %235 = vector.extract_strided_slice %234 {offsets = [0, 0], sizes = [8, 128], strides = [1, 1]} : vector<8x512xf32> to vector<8x128xf32>
    %236 = arith.negf %235 : vector<8x128xf32>
    %237 = math.exp %236 : vector<8x128xf32>
    %cst_77 = arith.constant 1.000000e+00 : f32
    %238 = vector.broadcast %cst_77 : f32 to vector<8x128xf32>
    %239 = arith.addf %238, %237 : vector<8x128xf32>
    %240 = arith.divf %238, %239 : vector<8x128xf32>
    %241 = vector.extract_strided_slice %234 {offsets = [0, 128], sizes = [8, 128], strides = [1, 1]} : vector<8x512xf32> to vector<8x128xf32>
    %242 = arith.negf %241 : vector<8x128xf32>
    %243 = math.exp %242 : vector<8x128xf32>
    %cst_78 = arith.constant 1.000000e+00 : f32
    %244 = vector.broadcast %cst_78 : f32 to vector<8x128xf32>
    %245 = arith.addf %244, %243 : vector<8x128xf32>
    %246 = arith.divf %244, %245 : vector<8x128xf32>
    %247 = vector.extract_strided_slice %234 {offsets = [0, 256], sizes = [8, 128], strides = [1, 1]} : vector<8x512xf32> to vector<8x128xf32>
    %248 = math.tanh %247 : vector<8x128xf32>
    %249 = vector.extract_strided_slice %234 {offsets = [0, 384], sizes = [8, 128], strides = [1, 1]} : vector<8x512xf32> to vector<8x128xf32>
    %250 = arith.negf %249 : vector<8x128xf32>
    %251 = math.exp %250 : vector<8x128xf32>
    %cst_79 = arith.constant 1.000000e+00 : f32
    %252 = vector.broadcast %cst_79 : f32 to vector<8x128xf32>
    %253 = arith.addf %252, %251 : vector<8x128xf32>
    %254 = arith.divf %252, %253 : vector<8x128xf32>
    %255 = arith.mulf %246, %221 : vector<8x128xf32>
    %256 = arith.mulf %240, %248 : vector<8x128xf32>
    %257 = arith.addf %255, %256 : vector<8x128xf32>
    %258 = math.tanh %257 : vector<8x128xf32>
    %259 = arith.mulf %254, %258 : vector<8x128xf32>
    %260 = arith.index_cast %c6_i32 : i32 to index
    %c0_80 = arith.constant 0 : index
    %c0_81 = arith.constant 0 : index
    %261 = vector.load %arg11[%260, %c0_80, %c0_81] : memref<8x8x128xf32, #tpu.memory_space<vmem>>, vector<1x8x128xf32>
    %262 = vector.shape_cast %261 : vector<1x8x128xf32> to vector<8x128xf32>
    %263 = vector.shape_cast %259 : vector<8x128xf32> to vector<1x8x128xf32>
    tpu.vector_store %arg11[%260, %c0_80, %c0_81], %263 {strides = array<i32>} : memref<8x8x128xf32, #tpu.memory_space<vmem>>, vector<1x8x128xf32>,
    %c7_i32 = arith.constant 7 : i32
    %c8_i32_82 = arith.constant 8 : i32
    %264 = arith.muli %c7_i32, %c8_i32_82 : i32
    %265 = tpu.assume_multiple %264, 8 : i32
    %266 = arith.index_cast %265 : i32 to index
    %c0_83 = arith.constant 0 : index
    %267 = vector.load %arg10[%266, %c0_83] : memref<64x512xf32, #tpu.memory_space<vmem>>, vector<8x512xf32>
    %c0_84 = arith.constant 0 : index
    %c0_85 = arith.constant 0 : index
    %268 = vector.load %arg3[%c0_84, %c0_85] : memref<128x512xf32, #tpu.memory_space<vmem>>, vector<128x512xf32>
    %cst_86 = arith.constant dense<0.000000e+00> : vector<8x512xf32>
    %269 = tpu.matmul %259, %268, %cst_86 {dimension_numbers = #tpu.dot_dimension_numbers<[1], [0], [0], [1], [0, 0, 1, 1], [], []>} : vector<8x128xf32>, vector<128x512xf32>, vector<8x512xf32> -> vector<8x512xf32>
    %270 = arith.addf %267, %269 : vector<8x512xf32>
    %271 = vector.extract_strided_slice %270 {offsets = [0, 0], sizes = [8, 128], strides = [1, 1]} : vector<8x512xf32> to vector<8x128xf32>
    %272 = arith.negf %271 : vector<8x128xf32>
    %273 = math.exp %272 : vector<8x128xf32>
    %cst_87 = arith.constant 1.000000e+00 : f32
    %274 = vector.broadcast %cst_87 : f32 to vector<8x128xf32>
    %275 = arith.addf %274, %273 : vector<8x128xf32>
    %276 = arith.divf %274, %275 : vector<8x128xf32>
    %277 = vector.extract_strided_slice %270 {offsets = [0, 128], sizes = [8, 128], strides = [1, 1]} : vector<8x512xf32> to vector<8x128xf32>
    %278 = arith.negf %277 : vector<8x128xf32>
    %279 = math.exp %278 : vector<8x128xf32>
    %cst_88 = arith.constant 1.000000e+00 : f32
    %280 = vector.broadcast %cst_88 : f32 to vector<8x128xf32>
    %281 = arith.addf %280, %279 : vector<8x128xf32>
    %282 = arith.divf %280, %281 : vector<8x128xf32>
    %283 = vector.extract_strided_slice %270 {offsets = [0, 256], sizes = [8, 128], strides = [1, 1]} : vector<8x512xf32> to vector<8x128xf32>
    %284 = math.tanh %283 : vector<8x128xf32>
    %285 = vector.extract_strided_slice %270 {offsets = [0, 384], sizes = [8, 128], strides = [1, 1]} : vector<8x512xf32> to vector<8x128xf32>
    %286 = arith.negf %285 : vector<8x128xf32>
    %287 = math.exp %286 : vector<8x128xf32>
    %cst_89 = arith.constant 1.000000e+00 : f32
    %288 = vector.broadcast %cst_89 : f32 to vector<8x128xf32>
    %289 = arith.addf %288, %287 : vector<8x128xf32>
    %290 = arith.divf %288, %289 : vector<8x128xf32>
    %291 = arith.mulf %282, %257 : vector<8x128xf32>
    %292 = arith.mulf %276, %284 : vector<8x128xf32>
    %293 = arith.addf %291, %292 : vector<8x128xf32>
    %294 = math.tanh %293 : vector<8x128xf32>
    %295 = arith.mulf %290, %294 : vector<8x128xf32>
    %296 = arith.index_cast %c7_i32 : i32 to index
    %c0_90 = arith.constant 0 : index
    %c0_91 = arith.constant 0 : index
    %297 = vector.load %arg11[%296, %c0_90, %c0_91] : memref<8x8x128xf32, #tpu.memory_space<vmem>>, vector<1x8x128xf32>
    %298 = vector.shape_cast %297 : vector<1x8x128xf32> to vector<8x128xf32>
    %299 = vector.shape_cast %295 : vector<8x128xf32> to vector<1x8x128xf32>
    tpu.vector_store %arg11[%296, %c0_90, %c0_91], %299 {strides = array<i32>} : memref<8x8x128xf32, #tpu.memory_space<vmem>>, vector<1x8x128xf32>,
    %c8_i32_92 = arith.constant 8 : i32
    %c0_93 = arith.constant 0 : index
    %c0_94 = arith.constant 0 : index
    %300 = vector.load %arg8[%c0_93, %c0_94] : memref<8x128xf32, #tpu.memory_space<vmem>>, vector<8x128xf32>
    tpu.vector_store %arg8[%c0_93, %c0_94], %295 {strides = array<i32>} : memref<8x128xf32, #tpu.memory_space<vmem>>, vector<8x128xf32>,
    %c0_95 = arith.constant 0 : index
    %c0_96 = arith.constant 0 : index
    %301 = vector.load %arg9[%c0_95, %c0_96] : memref<8x128xf32, #tpu.memory_space<vmem>>, vector<8x128xf32>
    tpu.vector_store %arg9[%c0_95, %c0_96], %293 {strides = array<i32>} : memref<8x128xf32, #tpu.memory_space<vmem>>, vector<8x128xf32>,
    %c0_97 = arith.constant 0 : index
    %c0_98 = arith.constant 0 : index
    %c0_99 = arith.constant 0 : index
    %302 = vector.load %arg11[%c0_97, %c0_98, %c0_99] : memref<8x8x128xf32, #tpu.memory_space<vmem>>, vector<8x8x128xf32>
    %c0_100 = arith.constant 0 : index
    %c0_101 = arith.constant 0 : index
    %303 = vector.load %arg5[%c0_100, %c0_101] : memref<1x128xf32, #tpu.memory_space<vmem>>, vector<1x128xf32>
    %304 = vector.shape_cast %303 : vector<1x128xf32> to vector<1x1x128xf32>
    %305 = vector.broadcast %304 : vector<1x1x128xf32> to vector<8x8x128xf32>
    %306 = arith.mulf %302, %305 : vector<8x8x128xf32>
    %cst_102 = arith.constant dense<0.000000e+00> : vector<8x8xf32>
    %307 = vector.multi_reduction <add>, %306, %cst_102 [2] : vector<8x8x128xf32> to vector<8x8xf32>
    %c0_103 = arith.constant 0 : index
    %c0_104 = arith.constant 0 : index
    %308 = vector.load %arg6[%c0_103, %c0_104] : memref<1x1xf32, #tpu.memory_space<vmem>>, vector<1x1xf32>
    %309 = vector.broadcast %308 : vector<1x1xf32> to vector<8x8xf32>
    %310 = arith.addf %307, %309 : vector<8x8xf32>
    %311 = arith.negf %310 : vector<8x8xf32>
    %312 = math.exp %311 : vector<8x8xf32>
    %cst_105 = arith.constant 1.000000e+00 : f32
    %313 = vector.broadcast %cst_105 : f32 to vector<8x8xf32>
    %314 = arith.addf %313, %312 : vector<8x8xf32>
    %315 = arith.divf %313, %314 : vector<8x8xf32>
    %c0_106 = arith.constant 0 : index
    %c0_107 = arith.constant 0 : index
    %316 = vector.load %arg7[%c0_106, %c0_107] : memref<8x8xf32, #tpu.memory_space<vmem>>, vector<8x8xf32>
    tpu.vector_store %arg7[%c0_106, %c0_107], %315 {strides = array<i32>} : memref<8x8xf32, #tpu.memory_space<vmem>>, vector<8x8xf32>,
    return
  }
  func.func @transform_0(%arg0: i32) -> (i32, i32) {
    %c0_i32 = arith.constant 0 : i32
    %c0_i32_0 = arith.constant 0 : i32
    return %arg0, %c0_i32 : i32, i32
  }
  func.func @transform_1(%arg0: i32) -> (i32, i32) {
    %c0_i32 = arith.constant 0 : i32
    %c0_i32_0 = arith.constant 0 : i32
    %c0_i32_1 = arith.constant 0 : i32
    return %c0_i32, %c0_i32_0 : i32, i32
  }
  func.func @transform_2(%arg0: i32) -> (i32, i32) {
    %c0_i32 = arith.constant 0 : i32
    %c0_i32_0 = arith.constant 0 : i32
    %c0_i32_1 = arith.constant 0 : i32
    return %c0_i32, %c0_i32_0 : i32, i32
  }
  func.func @transform_3(%arg0: i32) -> (i32, i32) {
    %c0_i32 = arith.constant 0 : i32
    %c0_i32_0 = arith.constant 0 : i32
    %c0_i32_1 = arith.constant 0 : i32
    return %c0_i32, %c0_i32_0 : i32, i32
  }
  func.func @transform_4(%arg0: i32) -> (i32, i32) {
    %c0_i32 = arith.constant 0 : i32
    %c0_i32_0 = arith.constant 0 : i32
    %c0_i32_1 = arith.constant 0 : i32
    return %c0_i32, %c0_i32_0 : i32, i32
  }
  func.func @transform_5(%arg0: i32) -> (i32, i32) {
    %c0_i32 = arith.constant 0 : i32
    %c0_i32_0 = arith.constant 0 : i32
    %c0_i32_1 = arith.constant 0 : i32
    return %c0_i32, %c0_i32_0 : i32, i32
  }
  func.func @transform_6(%arg0: i32) -> (i32, i32) {
    %c0_i32 = arith.constant 0 : i32
    %c0_i32_0 = arith.constant 0 : i32
    return %arg0, %c0_i32 : i32, i32
  }
}

</mosaic_0001>

<bundles_post_ra>
// kernel: verification_rnn_forward.1
= control target key start
LH: loop header
LB: loop body
LE: loop exit
PB: predicated region body
PF: predicated region fallthrough
CT: control target
= control target key end

     0   :  { %v4286_v3 = vmov 0.0   ;;  %vm69_vm0 = vcmask 130048   ;;  %vm2446_vm1 = vcmask 1041409   ;;  %vm2448_vm2 = vcmask 1042434   ;;  %s4279_s1 = inlined_call_operand.vmem [shape: f32[16,512], index: 1, kind: input, shape index: {}]   ;;  %s4280_s0 = inlined_call_operand.vmem [shape: f32[64,16], index: 0, kind: input, shape index: {}]   ;;  %s4281_s2 = inlined_call_operand.vmem [shape: f32[128,512], index: 2, kind: input, shape index: {}]   ;;  %s4282_s3 = inlined_call_operand.vmem [shape: f32[1,512], index: 3, kind: input, shape index: {}]   ;;  %s4283_s4 = inlined_call_operand.vmem [shape: f32[1,128], index: 4, kind: input, shape index: {}]   ;;  %s4284_s5 = inlined_call_operand.<no memory space> [shape: f32[1,1], index: 5, kind: input, shape index: {}]   ;;  %s4285_s6 = inlined_call_operand.vmem [shape: f32[8,8], index: 6, kind: output, shape index: {}]  }
   0x1   :  { %v44_v0 = vld [vmem:[%s4279_s1 + $0x28] sm:$0xff]  ;;  %v46_v1 = vld [vmem:[%s4279_s1 + $0x38] sm:$0xff]  ;;  %v43_v2 = vld [vmem:[%s4279_s1 + $0x20] sm:$0xff]  ;;  %158 = vmatprep.mubr.f32.mxu0 %v4286_v3  ;;  %271 = vmatprep.mubr.f32.mxu1 %v4286_v3  ;;  %vm2450_vm3 = vcmask 1043459   ;;  %vm2452_vm4 = vcmask 1044484   ;;  %vm2454_vm5 = vcmask 1045509  }
   0x2   :  { %122 = vmatprep.subr.mxu0 %v44_v0  ;;  %235 = vmatprep.subr.mxu1 %v46_v1  ;;  %v45_v4 = vld [vmem:[%s4279_s1 + $0x30] sm:$0xff]  ;;  %v40_v5 = vld [vmem:[%s4279_s1 + $0x8] sm:$0xff]  ;;  %v42_v6 = vld [vmem:[%s4279_s1 + $0x18] sm:$0xff]  ;;  %vm2456_vm6 = vcmask 1046534   ;;  %vm2458_vm7 = vcmask 1047559   ;;  %vm2461_vm8 = vcmask 64512  }
   0x3   :  { %123 = vmatpush1.msra.mxu0 %v43_v2  ;;  %236 = vmatpush1.msra.mxu1 %v45_v4  ;;  %v39_v7 = vld [vmem:[%s4279_s1] sm:$0xff]  ;;  %v41_v8 = vld [vmem:[%s4279_s1 + $0x10] sm:$0xff]  ;;  %v2757_v10 = vld [vmem:[%s4281_s2 + $0x1e8] sm:$0xff] }
   0x4   :  { %v31_v9 = vld [vmem:[%s4280_s0] sm:$0xff]  ;;  %124 = vmatprep.subr.mxu0 %v40_v5  ;;  %237 = vmatprep.subr.mxu1 %v42_v6  ;;  %v2762_v11 = vld [vmem:[%s4281_s2 + $0x1f8] sm:$0xff]  ;;  %v2772_v13 = vld [vmem:[%s4281_s2 + $0x1f0] sm:$0xff] }
   0x5   :  { %125 = vmatpush1.msra.mxu0 %v39_v7  ;;  %238 = vmatpush1.msra.mxu1 %v41_v8  ;;  %v2767_v12 = vld [vmem:[%s4281_s2 + $0x1e0] sm:$0xff]  ;;  %v2779_v14 = vld [vmem:[%s4281_s2 + $0x1c8] sm:$0xff]  ;;  %v2784_v15 = vld [vmem:[%s4281_s2 + $0x1d8] sm:$0xff] }
   0x6   :  { %2474 = vmatmul.mubr.msk.f32.vlgmr.msra.gmra.mxu0 %vm69_vm0, %v31_v9  ;;  %2482 = vmatmul.mubr.msk.f32.vlgmr.msra.gmra.mxu1 %vm69_vm0, %v31_v9  ;;  %v2793_v16 = vld [vmem:[%s4281_s2 + $0x1c0] sm:$0xff]  ;;  %v2798_v17 = vld [vmem:[%s4281_s2 + $0x1d0] sm:$0xff]  ;;  %v32_v18 = vld [vmem:[%s4280_s0 + $0x8] sm:$0xff] }
   0x7   :  { %425 = vmatprep.subr.mxu0 %v2757_v10  ;;  %496 = vmatprep.subr.mxu1 %v2762_v11  ;;  %v2810_v19 = vld [vmem:[%s4281_s2 + $0x1a8] sm:$0xff]  ;;  %v2815_v20 = vld [vmem:[%s4281_s2 + $0x1b8] sm:$0xff]  ;;  %v2822_v21 = vld [vmem:[%s4281_s2 + $0x1a0] sm:$0xff] }
   0x8   :  { %426 = vmatpush1.msra.mxu0 %v2767_v12  ;;  %497 = vmatpush1.msra.mxu1 %v2772_v13  ;;  %v2827_v22 = vld [vmem:[%s4281_s2 + $0x1b0] sm:$0xff]  ;;  %v2834_v23 = vld [vmem:[%s4281_s2 + $0x188] sm:$0xff]  ;;  %v2839_v24 = vld [vmem:[%s4281_s2 + $0x198] sm:$0xff] }
   0x9   :  { %427 = vmatprep.subr.mxu0 %v2779_v14  ;;  %498 = vmatprep.subr.mxu1 %v2784_v15  ;;  %v2848_v25 = vld [vmem:[%s4281_s2 + $0x180] sm:$0xff]  ;;  %v2853_v26 = vld [vmem:[%s4281_s2 + $0x190] sm:$0xff]  ;;  %v2865_v28 = vld [vmem:[%s4281_s2 + $0x168] sm:$0xff] }
   0xa   :  { %164 = vmatprep.mubr.f32.mxu0 %v4286_v3  ;;  %277 = vmatprep.mubr.f32.mxu1 %v4286_v3  ;;  %v33_v27 = vld [vmem:[%s4280_s0 + $0x10] sm:$0xff]  ;;  %v2870_v29 = vld [vmem:[%s4281_s2 + $0x178] sm:$0xff]  ;;  %v2877_v30 = vld [vmem:[%s4281_s2 + $0x160] sm:$0xff] }
   0xb   :  { %428 = vmatpush1.msra.mxu0 %v2793_v16  ;;  %499 = vmatpush1.msra.mxu1 %v2798_v17  ;;  %v2882_v31 = vld [vmem:[%s4281_s2 + $0x170] sm:$0xff]  ;;  %v2889_v32 = vld [vmem:[%s4281_s2 + $0x148] sm:$0xff]  ;;  %v2894_v33 = vld [vmem:[%s4281_s2 + $0x158] sm:$0xff] }
   0xc   :  { %2475 = vmatmul.mubr.msk.f32.gmra.mxu0 %vm69_vm0, %v32_v18  ;;  %2483 = vmatmul.mubr.msk.f32.gmra.mxu1 %vm69_vm0, %v32_v18  ;;  %v2903_v34 = vld [vmem:[%s4281_s2 + $0x140] sm:$0xff]  ;;  %v2908_v35 = vld [vmem:[%s4281_s2 + $0x150] sm:$0xff]  ;;  %v34_v36 = vld [vmem:[%s4280_s0 + $0x18] sm:$0xff] }
   0xd   :  { %429 = vmatprep.subr.mxu0 %v2810_v19  ;;  %500 = vmatprep.subr.mxu1 %v2815_v20  ;;  %v2920_v37 = vld [vmem:[%s4281_s2 + $0x128] sm:$0xff]  ;;  %v2925_v38 = vld [vmem:[%s4281_s2 + $0x138] sm:$0xff]  ;;  %v2932_v39 = vld [vmem:[%s4281_s2 + $0x120] sm:$0xff] }
   0xe   :  { %430 = vmatpush1.msra.mxu0 %v2822_v21  ;;  %501 = vmatpush1.msra.mxu1 %v2827_v22  ;;  %v2937_v40 = vld [vmem:[%s4281_s2 + $0x130] sm:$0xff]  ;;  %v2944_v41 = vld [vmem:[%s4281_s2 + $0x108] sm:$0xff]  ;;  %v2949_v42 = vld [vmem:[%s4281_s2 + $0x118] sm:$0xff] }
   0xf   :  { %431 = vmatprep.subr.mxu0 %v2834_v23  ;;  %502 = vmatprep.subr.mxu1 %v2839_v24  ;;  %v2958_v43 = vld [vmem:[%s4281_s2 + $0x100] sm:$0xff]  ;;  %v2963_v44 = vld [vmem:[%s4281_s2 + $0x110] sm:$0xff]  ;;  %v2975_v46 = vld [vmem:[%s4281_s2 + $0xe8] sm:$0xff] }
  0x10   :  { %170 = vmatprep.mubr.f32.mxu0 %v4286_v3  ;;  %283 = vmatprep.mubr.f32.mxu1 %v4286_v3  ;;  %v35_v45 = vld [vmem:[%s4280_s0 + $0x20] sm:$0xff]  ;;  %v2980_v47 = vld [vmem:[%s4281_s2 + $0xf8] sm:$0xff]  ;;  %v2992_v49 = vld [vmem:[%s4281_s2 + $0xf0] sm:$0xff] }
  0x11   :  { %432 = vmatpush1.msra.mxu0 %v2848_v25  ;;  %503 = vmatpush1.msra.mxu1 %v2853_v26  ;;  %v2987_v48 = vld [vmem:[%s4281_s2 + $0xe0] sm:$0xff]  ;;  %v2999_v50 = vld [vmem:[%s4281_s2 + $0xc8] sm:$0xff]  ;;  %v3004_v51 = vld [vmem:[%s4281_s2 + $0xd8] sm:$0xff] }
  0x12   :  { %2476 = vmatmul.mubr.msk.f32.gmra.mxu0 %vm69_vm0, %v33_v27  ;;  %2484 = vmatmul.mubr.msk.f32.gmra.mxu1 %vm69_vm0, %v33_v27  ;;  %v3013_v52 = vld [vmem:[%s4281_s2 + $0xc0] sm:$0xff]  ;;  %v3018_v53 = vld [vmem:[%s4281_s2 + $0xd0] sm:$0xff]  ;;  %v36_v54 = vld [vmem:[%s4280_s0 + $0x28] sm:$0xff] }
  0x13   :  { %433 = vmatprep.subr.mxu0 %v2865_v28  ;;  %504 = vmatprep.subr.mxu1 %v2870_v29  ;;  %v3030_v55 = vld [vmem:[%s4281_s2 + $0xa8] sm:$0xff]  ;;  %v3035_v56 = vld [vmem:[%s4281_s2 + $0xb8] sm:$0xff]  ;;  %v3042_v57 = vld [vmem:[%s4281_s2 + $0xa0] sm:$0xff] }
  0x14   :  { %434 = vmatpush1.msra.mxu0 %v2877_v30  ;;  %505 = vmatpush1.msra.mxu1 %v2882_v31  ;;  %v3047_v58 = vld [vmem:[%s4281_s2 + $0xb0] sm:$0xff]  ;;  %v3054_v59 = vld [vmem:[%s4281_s2 + $0x88] sm:$0xff]  ;;  %v3059_v60 = vld [vmem:[%s4281_s2 + $0x98] sm:$0xff] }
  0x15   :  { %435 = vmatprep.subr.mxu0 %v2889_v32  ;;  %506 = vmatprep.subr.mxu1 %v2894_v33  ;;  %4355 = vst [vmem:[#allocation7_spill] sm:$0xff] %v3054_v59  ;;  %4356 = vst [vmem:[#allocation8_spill] sm:$0xff] %v3059_v60  ;;  %v3068_v61 = vld [vmem:[%s4281_s2 + $0x80] sm:$0xff]  ;;  %v3073_v62 = vld [vmem:[%s4281_s2 + $0x90] sm:$0xff] }
  0x16   :  { %176 = vmatprep.mubr.f32.mxu0 %v4286_v3  ;;  %289 = vmatprep.mubr.f32.mxu1 %v4286_v3  ;;  %4357 = vst [vmem:[#allocation9_spill] sm:$0xff] %v3068_v61  ;;  %4358 = vst [vmem:[#allocation10_spill] sm:$0xff] %v3073_v62  ;;  %v37_v63 = vld [vmem:[%s4280_s0 + $0x30] sm:$0xff]  ;;  %v3085_v0 = vld [vmem:[%s4281_s2 + $0x68] sm:$0xff] }
  0x17   :  { %436 = vmatpush1.msra.mxu0 %v2903_v34  ;;  %507 = vmatpush1.msra.mxu1 %v2908_v35  ;;  %4359 = vst [vmem:[#allocation11_spill] sm:$0xff] %v3085_v0  ;;  %v3090_v1 = vld [vmem:[%s4281_s2 + $0x78] sm:$0xff]  ;;  %v3097_v2 = vld [vmem:[%s4281_s2 + $0x60] sm:$0xff]  ;;  %v3102_v4 = vld [vmem:[%s4281_s2 + $0x70] sm:$0xff] }
  0x18   :  { %2477 = vmatmul.mubr.msk.f32.gmra.mxu0 %vm69_vm0, %v34_v36  ;;  %2485 = vmatmul.mubr.msk.f32.gmra.mxu1 %vm69_vm0, %v34_v36  ;;  %4360 = vst [vmem:[#allocation12_spill] sm:$0xff] %v3090_v1  ;;  %4361 = vst [vmem:[#allocation13_spill] sm:$0xff] %v3097_v2  ;;  %v3109_v5 = vld [vmem:[%s4281_s2 + $0x48] sm:$0xff]  ;;  %v3114_v6 = vld [vmem:[%s4281_s2 + $0x58] sm:$0xff] }
  0x19   :  { %437 = vmatprep.subr.mxu0 %v2920_v37  ;;  %508 = vmatprep.subr.mxu1 %v2925_v38  ;;  %4362 = vst [vmem:[#allocation14_spill] sm:$0xff] %v3102_v4  ;;  %4363 = vst [vmem:[#allocation15_spill] sm:$0xff] %v3109_v5  ;;  %v3123_v7 = vld [vmem:[%s4281_s2 + $0x40] sm:$0xff]  ;;  %v3128_v8 = vld [vmem:[%s4281_s2 + $0x50] sm:$0xff] }
  0x1a   :  { %438 = vmatpush1.msra.mxu0 %v2932_v39  ;;  %509 = vmatpush1.msra.mxu1 %v2937_v40  ;;  %4364 = vst [vmem:[#allocation16_spill] sm:$0xff] %v3114_v6  ;;  %4365 = vst [vmem:[#allocation17_spill] sm:$0xff] %v3123_v7  ;;  %v38_v9 = vld [vmem:[%s4280_s0 + $0x38] sm:$0xff]  ;;  %v3140_v18 = vld [vmem:[%s4281_s2 + $0x28] sm:$0xff] }
  0x1b   :  { %439 = vmatprep.subr.mxu0 %v2944_v41  ;;  %510 = vmatprep.subr.mxu1 %v2949_v42  ;;  %4366 = vst [vmem:[#allocation18_spill] sm:$0xff] %v3128_v8  ;;  %4367 = vst [vmem:[#allocation19_spill] sm:$0xff] %v3140_v18  ;;  %v3145_v27 = vld [vmem:[%s4281_s2 + $0x38] sm:$0xff]  ;;  %v3152_v36 = vld [vmem:[%s4281_s2 + $0x20] sm:$0xff] }
  0x1c   :  { %182 = vmatprep.mubr.f32.mxu0 %v4286_v3  ;;  %295 = vmatprep.mubr.f32.mxu1 %v4286_v3  ;;  %4368 = vst [vmem:[#allocation20_spill] sm:$0xff] %v3145_v27  ;;  %4369 = vst [vmem:[#allocation21_spill] sm:$0xff] %v3152_v36 }
  0x1d   :  { %440 = vmatpush1.msra.mxu0 %v2958_v43  ;;  %511 = vmatpush1.msra.mxu1 %v2963_v44 }
  0x1e   :  { %2478 = vmatmul.mubr.msk.f32.gmra.mxu0 %vm69_vm0, %v35_v45  ;;  %2486 = vmatmul.mubr.msk.f32.gmra.mxu1 %vm69_vm0, %v35_v45  ;;  %v3157_v45 = vld [vmem:[%s4281_s2 + $0x30] sm:$0xff] }
  0x1f   :  { %441 = vmatprep.subr.mxu0 %v2975_v46  ;;  %512 = vmatprep.subr.mxu1 %v2980_v47  ;;  %4370 = vst [vmem:[#allocation22_spill] sm:$0xff] %v3157_v45 }
  0x20   :  { %442 = vmatpush1.msra.mxu0 %v2987_v48  ;;  %513 = vmatpush1.msra.mxu1 %v2992_v49 }
  0x21   :  { %443 = vmatprep.subr.mxu0 %v2999_v50  ;;  %514 = vmatprep.subr.mxu1 %v3004_v51 }
  0x22   :  { %188 = vmatprep.mubr.f32.mxu0 %v4286_v3  ;;  %301 = vmatprep.mubr.f32.mxu1 %v4286_v3 }
  0x23   :  { %444 = vmatpush1.msra.mxu0 %v3013_v52  ;;  %515 = vmatpush1.msra.mxu1 %v3018_v53 }
  0x24   :  { %2479 = vmatmul.mubr.msk.f32.gmra.mxu0 %vm69_vm0, %v36_v54  ;;  %2487 = vmatmul.mubr.msk.f32.gmra.mxu1 %vm69_vm0, %v36_v54  ;;  %v3164_v54 = vld [vmem:[%s4281_s2 + $0x8] sm:$0xff] }
  0x25   :  { %445 = vmatprep.subr.mxu0 %v3030_v55  ;;  %516 = vmatprep.subr.mxu1 %v3035_v56  ;;  %4371 = vst [vmem:[#allocation23_spill] sm:$0xff] %v3164_v54 }
  0x26   :  { %446 = vmatpush1.msra.mxu0 %v3042_v57  ;;  %517 = vmatpush1.msra.mxu1 %v3047_v58 }
  0x27   :  { %447 = vmatprep.subr.mxu0 %v3054_v59  ;;  %518 = vmatprep.subr.mxu1 %v3059_v60 }
  0x28   :  { %194 = vmatprep.mubr.f32.mxu0 %v4286_v3  ;;  %307 = vmatprep.mubr.f32.mxu1 %v4286_v3 }
  0x29   :  { %448 = vmatpush1.msra.mxu0 %v3068_v61  ;;  %519 = vmatpush1.msra.mxu1 %v3073_v62 }
  0x2a   :  { %2480 = vmatmul.mubr.msk.f32.gmra.mxu0 %vm69_vm0, %v37_v63  ;;  %2488 = vmatmul.mubr.msk.f32.gmra.mxu1 %vm69_vm0, %v37_v63  ;;  %v3169_v63 = vld [vmem:[%s4281_s2 + $0x18] sm:$0xff] }
  0x2b   :  { %449 = vmatprep.subr.mxu0 %v3085_v0  ;;  %520 = vmatprep.subr.mxu1 %v3090_v1  ;;  %4372 = vst [vmem:[#allocation24_spill] sm:$0xff] %v3169_v63 }
  0x2c   :  { %450 = vmatpush1.msra.mxu0 %v3097_v2  ;;  %521 = vmatpush1.msra.mxu1 %v3102_v4 }
  0x2d   :  { %451 = vmatprep.subr.mxu0 %v3109_v5  ;;  %522 = vmatprep.subr.mxu1 %v3114_v6 }
  0x2e   :  { %200 = vmatprep.mubr.f32.mxu0 %v4286_v3  ;;  %313 = vmatprep.mubr.f32.mxu1 %v4286_v3  ;;  %v3176_v3 = vld [vmem:[%s4281_s2] sm:$0xff] }
  0x2f   :  { %452 = vmatpush1.msra.mxu0 %v3123_v7  ;;  %523 = vmatpush1.msra.mxu1 %v3128_v8  ;;  %4373 = vst [vmem:[#allocation25_spill] sm:$0xff] %v3176_v3 }
  0x30   :  { %2481 = vmatmul.mubr.msk.f32.gmra.mxu0 %vm69_vm0, %v38_v9  ;;  %2489 = vmatmul.mubr.msk.f32.gmra.mxu1 %vm69_vm0, %v38_v9  ;;  %v3183_v9 = vld [vmem:[%s4281_s2 + $0x10] sm:$0xff] }
  0x31   :  { %453 = vmatprep.subr.mxu0 %v3140_v18  ;;  %524 = vmatprep.subr.mxu1 %v3145_v27  ;;  %4374 = vst [vmem:[#allocation26_spill] sm:$0xff] %v3183_v9  ;;  %v4375_v27 = vmov 0.0  }
  0x32   :  { %454 = vmatpush1.msra.mxu0 %v3152_v36  ;;  %525 = vmatpush1.msra.mxu1 %v3157_v45 }
  0x33   :  { %455 = vmatprep.subr.mxu0 %v3164_v54  ;;  %526 = vmatprep.subr.mxu1 %v3169_v63 }
  0x34   :  { %456 = vmatpush1.msra.mxu0 %v3176_v3  ;;  %489 = vmatprep.mubr.f32.mxu0 %v4375_v27 }
  0x35   :  { %527 = vmatpush1.msra.mxu1 %v3183_v9  ;;  %560 = vmatprep.mubr.f32.mxu1 %v4375_v27 }
  0x36   :  { %490 = vmatmul.mubr.f32.vlgmr.msra.gmra.mxu0 %v4375_v27  ;;  %561 = vmatmul.mubr.f32.vlgmr.msra.gmra.mxu1 %v4375_v27 }
  0x37   :  { %667 = vmatprep.subr.mxu0 %v2757_v10  ;;  %738 = vmatprep.subr.mxu1 %v2762_v11 }
  0x38   :  { %668 = vmatpush1.msra.mxu0 %v2767_v12  ;;  %739 = vmatpush1.msra.mxu1 %v2772_v13 }
  0x39   :  { %669 = vmatprep.subr.mxu0 %v2779_v14  ;;  %740 = vmatprep.subr.mxu1 %v2784_v15 }
  0x3a   :  { %670 = vmatpush1.msra.mxu0 %v2793_v16  ;;  %741 = vmatpush1.msra.mxu1 %v2798_v17 }
  0x3b   :  { %671 = vmatprep.subr.mxu0 %v2810_v19  ;;  %742 = vmatprep.subr.mxu1 %v2815_v20 }
  0x3c   :  { %672 = vmatpush1.msra.mxu0 %v2822_v21  ;;  %743 = vmatpush1.msra.mxu1 %v2827_v22 }
  0x3d   :  { %673 = vmatprep.subr.mxu0 %v2834_v23  ;;  %744 = vmatprep.subr.mxu1 %v2839_v24 }
  0x3e   :  { %674 = vmatpush1.msra.mxu0 %v2848_v25  ;;  %745 = vmatpush1.msra.mxu1 %v2853_v26 }
  0x3f   :  { %675 = vmatprep.subr.mxu0 %v2865_v28  ;;  %746 = vmatprep.subr.mxu1 %v2870_v29 }
  0x40   :  { %676 = vmatpush1.msra.mxu0 %v2877_v30  ;;  %747 = vmatpush1.msra.mxu1 %v2882_v31 }
  0x41   :  { %677 = vmatprep.subr.mxu0 %v2889_v32  ;;  %748 = vmatprep.subr.mxu1 %v2894_v33 }
  0x42   :  { %678 = vmatpush1.msra.mxu0 %v2903_v34  ;;  %749 = vmatpush1.msra.mxu1 %v2908_v35 }
  0x43   :  { %679 = vmatprep.subr.mxu0 %v2920_v37  ;;  %750 = vmatprep.subr.mxu1 %v2925_v38 }
  0x44   :  { %680 = vmatpush1.msra.mxu0 %v2932_v39  ;;  %751 = vmatpush1.msra.mxu1 %v2937_v40 }
  0x45   :  { %681 = vmatprep.subr.mxu0 %v2944_v41  ;;  %752 = vmatprep.subr.mxu1 %v2949_v42 }
  0x46   :  { %682 = vmatpush1.msra.mxu0 %v2958_v43  ;;  %753 = vmatpush1.msra.mxu1 %v2963_v44 }
  0x47   :  { %683 = vmatprep.subr.mxu0 %v2975_v46  ;;  %754 = vmatprep.subr.mxu1 %v2980_v47 }
  0x48   :  { %684 = vmatpush1.msra.mxu0 %v2987_v48  ;;  %755 = vmatpush1.msra.mxu1 %v2992_v49 }
  0x49   :  { %685 = vmatprep.subr.mxu0 %v2999_v50  ;;  %756 = vmatprep.subr.mxu1 %v3004_v51 }
  0x4a   :  { %686 = vmatpush1.msra.mxu0 %v3013_v52  ;;  %757 = vmatpush1.msra.mxu1 %v3018_v53 }
  0x4b   :  { %687 = vmatprep.subr.mxu0 %v3030_v55  ;;  %758 = vmatprep.subr.mxu1 %v3035_v56 }
  0x4c   :  { %688 = vmatpush1.msra.mxu0 %v3042_v57  ;;  %759 = vmatpush1.msra.mxu1 %v3047_v58 }
  0x4d   :  { %689 = vmatprep.subr.mxu0 %v3054_v59  ;;  %760 = vmatprep.subr.mxu1 %v3059_v60 }
  0x4e   :  { %690 = vmatpush1.msra.mxu0 %v3068_v61  ;;  %761 = vmatpush1.msra.mxu1 %v3073_v62  ;;  %v4376_v61 = vld [vmem:[#allocation20_spill] sm:$0xff] }
  0x4f   :  { %691 = vmatprep.subr.mxu0 %v3085_v0  ;;  %762 = vmatprep.subr.mxu1 %v3090_v1 }
  0x50   :  { %692 = vmatpush1.msra.mxu0 %v3097_v2  ;;  %763 = vmatpush1.msra.mxu1 %v3102_v4 }
  0x51   :  { %693 = vmatprep.subr.mxu0 %v3109_v5  ;;  %764 = vmatprep.subr.mxu1 %v3114_v6 }
  0x52   :  { %694 = vmatpush1.msra.mxu0 %v3123_v7  ;;  %765 = vmatpush1.msra.mxu1 %v3128_v8 }
  0x53   :  { %695 = vmatprep.subr.mxu0 %v3140_v18  ;;  %766 = vmatprep.subr.mxu1 %v4376_v61  ;;  %v4298_v61 = vlaneseq }
  0x54   :  { %696 = vmatpush1.msra.mxu0 %v3152_v36  ;;  %767 = vmatpush1.msra.mxu1 %v3157_v45 }
  0x55   :  { %697 = vmatprep.subr.mxu0 %v3164_v54  ;;  %768 = vmatprep.subr.mxu1 %v3169_v63  ;;  %v3262_v36 = vshrl.u32 %v4298_v61, 7 }
  0x56   :  { %698 = vmatpush1.msra.mxu0 %v3176_v3  ;;  %731 = vmatprep.mubr.f32.mxu0 %v4375_v27 }
  0x57   :  { %769 = vmatpush1.msra.mxu1 %v3183_v9  ;;  %802 = vmatprep.mubr.f32.mxu1 %v4375_v27  ;;  %4377 = vst [vmem:[#allocation27_spill] sm:$0xff] %v3262_v36  ;;  %v51_v3 = vsub.s32 0, %v3262_v36  ;;  %v59_v63 = vsub.s32 2, %v3262_v36  ;;  %v47_v9 = vld [vmem:[%s4282_s3] sm:$0xf]  ;;  %v63_v61 = vsub.s32 3, %v3262_v36 }
  0x58   :  { %910 = vmatprep.subr.mxu0 %v2757_v10  ;;  %981 = vmatprep.subr.mxu1 %v2762_v11  ;;  %v55_v11 = vsub.s32 1, %v3262_v36 }
  0x59   :  { %v52_v18 = vrot.slane %v47_v9, %v51_v3  ;;  %v3279_v8 = vrot.slane %v47_v9, %v59_v63  ;;  %v3281_v4 = vrot.slane %v47_v9, %v63_v61 }
  0x5a   :  { %v56_v5 = vrot.slane %v47_v9, %v55_v11 }
  0xc6   :  { %v3264_v45 = vpop.f32.mrf.mxu0  ;;  %v3266_v54 = vpop.f32.mrf.mxu1 }
  0xc8   :  { %v3273_v27 = vpop.f32.mrf.mxu0  ;;  %v3275_v10 = vpop.f32.mrf.mxu1 }
  0xcc   :  { %v166_v7 = vpop.f32.mrf.mxu0  ;;  %v279_v6 = vpop.f32.mrf.mxu1 }
  0xcd   :  { %v3283_v2 = vadd.f32 %v166_v7, %v52_v18  ;;  %v3286_v1 = vadd.f32 %v279_v6, %v3279_v8 }
  0xce   :  { %v168_v0 = vpop.f32.mrf.mxu0  ;;  %v281_v62 = vpop.f32.mrf.mxu1 }
  0xcf   :  { %4378 = vst [vmem:[#allocation28_spill] sm:$0xff] %v3283_v2  ;;  %4379 = vst [vmem:[#allocation29_spill] sm:$0xff] %v3286_v1  ;;  %v3288_v60 = vadd.f32 %v168_v0, %v56_v5  ;;  %v3291_v59 = vadd.f32 %v281_v62, %v3281_v4 }
  0xd1   :  { %4380 = vst [vmem:[#allocation30_spill] sm:$0xff] %v3288_v60  ;;  %4381 = vst [vmem:[#allocation31_spill] sm:$0xff] %v3291_v59 }
  0xd2   :  { %v172_v3 = vpop.f32.mrf.mxu0  ;;  %v285_v63 = vpop.f32.mrf.mxu1 }
  0xd3   :  { %v3293_v36 = vadd.f32 %v172_v3, %v52_v18  ;;  %v3296_v11 = vadd.f32 %v285_v63, %v3279_v8 }
  0xd4   :  { %v174_v61 = vpop.f32.mrf.mxu0  ;;  %v287_v7 = vpop.f32.mrf.mxu1 }
  0xd5   :  { %4382 = vst [vmem:[#allocation32_spill] sm:$0xff] %v3293_v36  ;;  %4383 = vst [vmem:[#allocation33_spill] sm:$0xff] %v3296_v11  ;;  %v3298_v9 = vadd.f32 %v174_v61, %v56_v5  ;;  %v3301_v6 = vadd.f32 %v287_v7, %v3281_v4 }
  0xd7   :  { %4384 = vst [vmem:[#allocation34_spill] sm:$0xff] %v3298_v9  ;;  %4385 = vst [vmem:[#allocation35_spill] sm:$0xff] %v3301_v6 }
  0xd8   :  { %v178_v1 = vpop.f32.mrf.mxu0  ;;  %v291_v0 = vpop.f32.mrf.mxu1 }
  0xd9   :  { %v3303_v60 = vadd.f32 %v178_v1, %v52_v18  ;;  %v3306_v62 = vadd.f32 %v291_v0, %v3279_v8 }
  0xda   :  { %v180_v59 = vpop.f32.mrf.mxu0  ;;  %v293_v3 = vpop.f32.mrf.mxu1 }
  0xdb   :  { %4386 = vst [vmem:[#allocation36_spill] sm:$0xff] %v3303_v60  ;;  %4387 = vst [vmem:[#allocation37_spill] sm:$0xff] %v3306_v62  ;;  %v3308_v36 = vadd.f32 %v180_v59, %v56_v5  ;;  %v3311_v63 = vadd.f32 %v293_v3, %v3281_v4 }
  0xdd   :  { %4388 = vst [vmem:[#allocation38_spill] sm:$0xff] %v3308_v36  ;;  %4389 = vst [vmem:[#allocation39_spill] sm:$0xff] %v3311_v63 }
  0xde   :  { %v184_v11 = vpop.f32.mrf.mxu0  ;;  %v297_v61 = vpop.f32.mrf.mxu1 }
  0xdf   :  { %v3313_v9 = vadd.f32 %v184_v11, %v52_v18  ;;  %v3316_v7 = vadd.f32 %v297_v61, %v3279_v8 }
  0xe0   :  { %v186_v6 = vpop.f32.mrf.mxu0  ;;  %v299_v1 = vpop.f32.mrf.mxu1 }
  0xe1   :  { %4390 = vst [vmem:[#allocation40_spill] sm:$0xff] %v3313_v9  ;;  %4391 = vst [vmem:[#allocation41_spill] sm:$0xff] %v3316_v7  ;;  %v3318_v60 = vadd.f32 %v186_v6, %v56_v5  ;;  %v3321_v0 = vadd.f32 %v299_v1, %v3281_v4 }
  0xe3   :  { %4392 = vst [vmem:[#allocation42_spill] sm:$0xff] %v3318_v60  ;;  %4393 = vst [vmem:[#allocation43_spill] sm:$0xff] %v3321_v0 }
  0xe4   :  { %v190_v62 = vpop.f32.mrf.mxu0  ;;  %v303_v59 = vpop.f32.mrf.mxu1 }
  0xe5   :  { %v3323_v36 = vadd.f32 %v190_v62, %v52_v18  ;;  %v3326_v3 = vadd.f32 %v303_v59, %v3279_v8 }
  0xe6   :  { %v192_v63 = vpop.f32.mrf.mxu0  ;;  %v305_v11 = vpop.f32.mrf.mxu1 }
  0xe7   :  { %4394 = vst [vmem:[#allocation44_spill] sm:$0xff] %v3323_v36  ;;  %4395 = vst [vmem:[#allocation45_spill] sm:$0xff] %v3326_v3  ;;  %v3328_v9 = vadd.f32 %v192_v63, %v56_v5  ;;  %v3331_v61 = vadd.f32 %v305_v11, %v3281_v4 }
  0xe9   :  { %4396 = vst [vmem:[#allocation46_spill] sm:$0xff] %v3328_v9  ;;  %4397 = vst [vmem:[#allocation47_spill] sm:$0xff] %v3331_v61 }
  0xea   :  { %v196_v7 = vpop.f32.mrf.mxu0  ;;  %v309_v6 = vpop.f32.mrf.mxu1 }
  0xeb   :  { %v3333_v60 = vadd.f32 %v196_v7, %v52_v18  ;;  %v3336_v1 = vadd.f32 %v309_v6, %v3279_v8 }
  0xec   :  { %v198_v0 = vpop.f32.mrf.mxu0  ;;  %v311_v62 = vpop.f32.mrf.mxu1 }
  0xed   :  { %4398 = vst [vmem:[#allocation48_spill] sm:$0xff] %v3333_v60  ;;  %4399 = vst [vmem:[#allocation49_spill] sm:$0xff] %v3336_v1  ;;  %v3338_v36 = vadd.f32 %v198_v0, %v56_v5  ;;  %v3341_v59 = vadd.f32 %v311_v62, %v3281_v4  ;;  %v161_v0 = vadd.f32 %v3264_v45, %v52_v18 }
  0xee   :  { %v163_v62 = vadd.f32 %v3273_v27, %v56_v5 }
  0xef   :  { %4400 = vst [vmem:[#allocation50_spill] sm:$0xff] %v3338_v36  ;;  %4401 = vst [vmem:[#allocation51_spill] sm:$0xff] %v3341_v59 }
  0xf0   :  { %v202_v3 = vpop.f32.mrf.mxu0  ;;  %v315_v63 = vpop.f32.mrf.mxu1 }
  0xf1   :  { %v3343_v9 = vadd.f32 %v202_v3, %v52_v18  ;;  %v3346_v11 = vadd.f32 %v315_v63, %v3279_v8 }
  0xf2   :  { %v204_v61 = vpop.f32.mrf.mxu0  ;;  %v317_v7 = vpop.f32.mrf.mxu1 }
  0xf3   :  { %4402 = vst [vmem:[#allocation52_spill] sm:$0xff] %v3343_v9  ;;  %4403 = vst [vmem:[#allocation53_spill] sm:$0xff] %v3346_v11  ;;  %v3348_v60 = vadd.f32 %v204_v61, %v56_v5  ;;  %v3351_v6 = vadd.f32 %v317_v7, %v3281_v4  ;;  %v276_v61 = vadd.f32 %v3275_v10, %v3281_v4 }
  0xf4   :  { %v274_v7 = vadd.f32 %v3266_v54, %v3279_v8  ;;  %v3365_v54 = vld [vmem:[%s4283_s4] ss:$0 sm:$0xff] }
  0xf5   :  { %4404 = vst [vmem:[#allocation54_spill] sm:$0xff] %v3348_v60  ;;  %4405 = vst [vmem:[#allocation55_spill] sm:$0xff] %v3351_v6 }
  0xf6   :  { %v491_v1 = vpop.f32.mrf.mxu0  ;;  %v562_v9 = vpop.f32.mrf.mxu1 }
  0xf7   :  { %v567_v59 = vadd.f32 %v491_v1, %v161_v0  ;;  %v569_v6 = vadd.f32 %v562_v9, %v274_v7 }
  0xf8   :  { %v493_v36 = vpop.f32.mrf.mxu0  ;;  %v564_v11 = vpop.f32.mrf.mxu1 }
  0xf9   :  { %v2490_v2 = vmul.f32 -1.442695, %v567_v59  ;;  %v568_v3 = vadd.f32 %v493_v36, %v163_v62  ;;  %v570_v60 = vadd.f32 %v564_v11, %v276_v61 }
  0xfb   :  { %2527 = vpow2.f32 %v2490_v2  ;;  %v2491_v63 = vmul.f32 -1.442695, %v568_v3  ;;  %v2492_v18 = vmul.f32 -1.442695, %v570_v60 }
  0xfd   :  { %2529 = vpow2.f32 %v2491_v63 }
  0xfe   :  { %2531 = vpow2.f32 %v2492_v18 }
 0x108   :  { %v2528_v45 = vpop.eup %2527 }
 0x109   :  { %v574_v5 = vadd.f32 1.0, %v2528_v45 }
 0x10a   :  { %v2530_v27 = vpop.eup %2529 }
 0x10b   :  { %2533 = vrcp.f32 %v574_v5  ;;  %v580_v36 = vadd.f32 1.0, %v2530_v27  ;;  %v2532_v2 = vpop.eup %2531 }
 0x10c   :  { %2535 = vtanh.f32 %v569_v6  ;;  %v587_v62 = vadd.f32 1.0, %v2532_v2 }
 0x10d   :  { %2537 = vrcp.f32 %v580_v36 }
 0x10e   :  { %2539 = vrcp.f32 %v587_v62  ;;  %v3463_v62 = vld [vmem:[%s4281_s2 + $0x1f0] sm:$0xff] }
 0x118   :  { %v2534_v1 = vpop.eup %2533 }
 0x119   :  { %v2536_v59 = vpop.eup %2535 }
 0x11a   :  { %v2538_v0 = vpop.eup %2537  ;;  %v591_v10 = vmul.f32 %v2536_v59, %v2534_v1  ;;  %v3446_v1 = vld [vmem:[%s4281_s2 + $0x1e8] sm:$0xff]  ;;  %v3451_v59 = vld [vmem:[%s4281_s2 + $0x1f8] sm:$0xff] }
 0x11b   :  { %v590_v4 = vmul.f32 0.0, %v2538_v0  ;;  %v2540_v60 = vpop.eup %2539  ;;  %v3458_v0 = vld [vmem:[%s4281_s2 + $0x1e0] sm:$0xff] }
 0x11d   :  { %v3359_v11 = vadd.f32 %v591_v10, %v590_v4  ;;  %v3470_v4 = vld [vmem:[%s4281_s2 + $0x1c8] sm:$0xff]  ;;  %v3475_v10 = vld [vmem:[%s4281_s2 + $0x1d8] sm:$0xff] }
 0x11f   :  { %2541 = vtanh.f32 %v3359_v11 }
 0x12c   :  { %v2542_v8 = vpop.eup %2541 }
 0x12d   :  { %v594_v9 = vmul.f32 %v2542_v8, %v2540_v60  ;;  %v3487_v60 = vld [vmem:[%s4281_s2 + $0x1d0] sm:$0xff]  ;;  %v3494_v8 = vld [vmem:[%s4281_s2 + $0x1a8] sm:$0xff] }
 0x12f   :  { %732 = vmatmul.mubr.f32.vlgmr.msra.gmra.mxu0 %v594_v9  ;;  %803 = vmatmul.mubr.f32.vlgmr.msra.gmra.mxu1 %v594_v9  ;;  %v2314_v6 = vmul.f32 %v3365_v54, %v594_v9  ;;  %v3499_v9 = vld [vmem:[%s4281_s2 + $0x1b8] sm:$0xff] }
 0x130   :  { %911 = vmatpush1.msra.mxu0 %v2767_v12  ;;  %982 = vmatpush1.msra.mxu1 %v2772_v13  ;;  %v4406_v12 = vld [vmem:[#allocation7_spill] sm:$0xff]  ;;  %v4407_v13 = vld [vmem:[#allocation8_spill] sm:$0xff] }
 0x131   :  { %2322 = vadd.xlane.f32.xlu0 %v2314_v6  ;;  %912 = vmatprep.subr.mxu0 %v2779_v14  ;;  %v4408_v14 = vld [vmem:[#allocation9_spill] sm:$0xff]  ;;  %4431 = vst [vmem:[#allocation7_spill] sm:$0xff] %v3446_v1  ;;  %4432 = vst [vmem:[#allocation8_spill] sm:$0xff] %v3451_v59  ;;  %v3506_v6 = vld [vmem:[%s4281_s2 + $0x1a0] sm:$0xff] }
 0x132   :  { %983 = vmatprep.subr.mxu1 %v2784_v15  ;;  %913 = vmatpush1.msra.mxu0 %v2793_v16  ;;  %v4409_v15 = vld [vmem:[#allocation10_spill] sm:$0xff]  ;;  %v4410_v16 = vld [vmem:[#allocation11_spill] sm:$0xff] }
 0x133   :  { %984 = vmatpush1.msra.mxu1 %v2798_v17  ;;  %914 = vmatprep.subr.mxu0 %v2810_v19  ;;  %v4411_v17 = vld [vmem:[#allocation12_spill] sm:$0xff]  ;;  %v4412_v19 = vld [vmem:[#allocation13_spill] sm:$0xff] }
 0x134   :  { %985 = vmatprep.subr.mxu1 %v2815_v20  ;;  %915 = vmatpush1.msra.mxu0 %v2822_v21  ;;  %v4413_v20 = vld [vmem:[#allocation14_spill] sm:$0xff]  ;;  %v4414_v21 = vld [vmem:[#allocation15_spill] sm:$0xff] }
 0x135   :  { %986 = vmatpush1.msra.mxu1 %v2827_v22  ;;  %916 = vmatprep.subr.mxu0 %v2834_v23  ;;  %v4415_v22 = vld [vmem:[#allocation16_spill] sm:$0xff]  ;;  %v4416_v23 = vld [vmem:[#allocation17_spill] sm:$0xff] }
 0x136   :  { %987 = vmatprep.subr.mxu1 %v2839_v24  ;;  %917 = vmatpush1.msra.mxu0 %v2848_v25  ;;  %v4417_v24 = vld [vmem:[#allocation18_spill] sm:$0xff]  ;;  %v4418_v25 = vld [vmem:[#allocation19_spill] sm:$0xff] }
 0x137   :  { %988 = vmatpush1.msra.mxu1 %v2853_v26  ;;  %918 = vmatprep.subr.mxu0 %v2865_v28  ;;  %v4419_v26 = vld [vmem:[#allocation20_spill] sm:$0xff]  ;;  %v4420_v28 = vld [vmem:[#allocation21_spill] sm:$0xff] }
 0x138   :  { %989 = vmatprep.subr.mxu1 %v2870_v29  ;;  %919 = vmatpush1.msra.mxu0 %v2877_v30  ;;  %v4421_v29 = vld [vmem:[#allocation22_spill] sm:$0xff]  ;;  %v4422_v30 = vld [vmem:[#allocation23_spill] sm:$0xff] }
 0x139   :  { %990 = vmatpush1.msra.mxu1 %v2882_v31  ;;  %920 = vmatprep.subr.mxu0 %v2889_v32  ;;  %v4423_v31 = vld [vmem:[#allocation24_spill] sm:$0xff]  ;;  %v4424_v32 = vld [vmem:[#allocation25_spill] sm:$0xff] }
 0x13a   :  { %991 = vmatprep.subr.mxu1 %v2894_v33  ;;  %921 = vmatpush1.msra.mxu0 %v2903_v34  ;;  %v4425_v33 = vmov 0.0   ;;  %v4426_v34 = vld [vmem:[#allocation26_spill] sm:$0xff] }
 0x13b   :  { %992 = vmatpush1.msra.mxu1 %v2908_v35  ;;  %922 = vmatprep.subr.mxu0 %v2920_v37  ;;  %v4427_v37 = vld [vmem:[#allocation28_spill] sm:$0xff] }
 0x13c   :  { %993 = vmatprep.subr.mxu1 %v2925_v38  ;;  %923 = vmatpush1.msra.mxu0 %v2932_v39 }
 0x13d   :  { %994 = vmatpush1.msra.mxu1 %v2937_v40  ;;  %924 = vmatprep.subr.mxu0 %v2944_v41  ;;  %v4428_v41 = vld [vmem:[#allocation30_spill] sm:$0xff] }
 0x13e   :  { %995 = vmatprep.subr.mxu1 %v2949_v42  ;;  %925 = vmatpush1.msra.mxu0 %v2958_v43 }
 0x13f   :  { %996 = vmatpush1.msra.mxu1 %v2963_v44  ;;  %926 = vmatprep.subr.mxu0 %v2975_v46 }
 0x140   :  { %997 = vmatprep.subr.mxu1 %v2980_v47  ;;  %927 = vmatpush1.msra.mxu0 %v2987_v48  ;;  %v4429_v47 = vld [vmem:[#allocation31_spill] sm:$0xff] }
 0x141   :  { %998 = vmatpush1.msra.mxu1 %v2992_v49  ;;  %928 = vmatprep.subr.mxu0 %v2999_v50  ;;  %v4430_v49 = vld [vmem:[#allocation29_spill] sm:$0xff] }
 0x142   :  { %999 = vmatprep.subr.mxu1 %v3004_v51  ;;  %929 = vmatpush1.msra.mxu0 %v3013_v52 }
 0x143   :  { %1000 = vmatpush1.msra.mxu1 %v3018_v53  ;;  %930 = vmatprep.subr.mxu0 %v3030_v55 }
 0x144   :  { %1001 = vmatprep.subr.mxu1 %v3035_v56  ;;  %931 = vmatpush1.msra.mxu0 %v3042_v57 }
 0x145   :  { %1002 = vmatpush1.msra.mxu1 %v3047_v58  ;;  %932 = vmatprep.subr.mxu0 %v4406_v12  ;;  %v3511_v12 = vld [vmem:[%s4281_s2 + $0x1b0] sm:$0xff] }
 0x146   :  { %1003 = vmatprep.subr.mxu1 %v4407_v13  ;;  %933 = vmatpush1.msra.mxu0 %v4408_v14  ;;  %v3518_v13 = vld [vmem:[%s4281_s2 + $0x188] sm:$0xff]  ;;  %v3523_v14 = vld [vmem:[%s4281_s2 + $0x198] sm:$0xff] }
 0x147   :  { %1004 = vmatpush1.msra.mxu1 %v4409_v15  ;;  %934 = vmatprep.subr.mxu0 %v4410_v16  ;;  %v3530_v15 = vld [vmem:[%s4281_s2 + $0x180] sm:$0xff]  ;;  %v3535_v16 = vld [vmem:[%s4281_s2 + $0x190] sm:$0xff] }
 0x148   :  { %1005 = vmatprep.subr.mxu1 %v4411_v17  ;;  %935 = vmatpush1.msra.mxu0 %v4412_v19  ;;  %v3542_v17 = vld [vmem:[%s4281_s2 + $0x168] sm:$0xff]  ;;  %v3547_v19 = vld [vmem:[%s4281_s2 + $0x178] sm:$0xff] }
 0x149   :  { %1006 = vmatpush1.msra.mxu1 %v4413_v20  ;;  %936 = vmatprep.subr.mxu0 %v4414_v21  ;;  %v3554_v20 = vld [vmem:[%s4281_s2 + $0x160] sm:$0xff]  ;;  %v3559_v21 = vld [vmem:[%s4281_s2 + $0x170] sm:$0xff] }
 0x14a   :  { %1007 = vmatprep.subr.mxu1 %v4415_v22  ;;  %937 = vmatpush1.msra.mxu0 %v4416_v23  ;;  %v3566_v22 = vld [vmem:[%s4281_s2 + $0x148] sm:$0xff]  ;;  %v3571_v23 = vld [vmem:[%s4281_s2 + $0x158] sm:$0xff] }
 0x14b   :  { %1008 = vmatpush1.msra.mxu1 %v4417_v24  ;;  %938 = vmatprep.subr.mxu0 %v4418_v25  ;;  %v3578_v24 = vld [vmem:[%s4281_s2 + $0x140] sm:$0xff]  ;;  %v3583_v25 = vld [vmem:[%s4281_s2 + $0x150] sm:$0xff] }
 0x14c   :  { %1009 = vmatprep.subr.mxu1 %v4419_v26  ;;  %939 = vmatpush1.msra.mxu0 %v4420_v28  ;;  %v3590_v26 = vld [vmem:[%s4281_s2 + $0x128] sm:$0xff]  ;;  %v3595_v28 = vld [vmem:[%s4281_s2 + $0x138] sm:$0xff] }
 0x14d   :  { %1010 = vmatpush1.msra.mxu1 %v4421_v29  ;;  %940 = vmatprep.subr.mxu0 %v4422_v30  ;;  %v3602_v29 = vld [vmem:[%s4281_s2 + $0x120] sm:$0xff]  ;;  %v3607_v30 = vld [vmem:[%s4281_s2 + $0x130] sm:$0xff] }
 0x14e   :  { %1011 = vmatprep.subr.mxu1 %v4423_v31  ;;  %941 = vmatpush1.msra.mxu0 %v4424_v32  ;;  %v3614_v31 = vld [vmem:[%s4281_s2 + $0x108] sm:$0xff]  ;;  %v3619_v32 = vld [vmem:[%s4281_s2 + $0x118] sm:$0xff] }
 0x14f   :  { %974 = vmatprep.mubr.f32.mxu0 %v4425_v33  ;;  %1012 = vmatpush1.msra.mxu1 %v4426_v34  ;;  %v3624_v34 = vld [vmem:[%s4281_s2 + $0x100] sm:$0xff] }
 0x150   :  { %1045 = vmatprep.mubr.f32.mxu1 %v4425_v33  ;;  %1153 = vmatprep.subr.mxu0 %v3446_v1 }
 0x151   :  { %1224 = vmatprep.subr.mxu1 %v3451_v59 }
 0x1ef   :  { %v733_v35 = vpop.f32.mrf.mxu0  ;;  %v804_v43 = vpop.f32.mrf.mxu1 }
 0x1f0   :  { %v809_v38 = vadd.f32 %v733_v35, %v4427_v37  ;;  %v811_v50 = vadd.f32 %v804_v43, %v4430_v49  ;;  %v3631_v35 = vld [vmem:[%s4281_s2 + $0x110] sm:$0xff]  ;;  %v3636_v37 = vld [vmem:[%s4281_s2 + $0xe8] sm:$0xff]  ;;  %v3670_v43 = vld [vmem:[%s4281_s2 + $0xc0] sm:$0xff] }
 0x1f1   :  { %v735_v39 = vpop.f32.mrf.mxu0  ;;  %v806_v46 = vpop.f32.mrf.mxu1  ;;  %v3699_v49 = vld [vmem:[%s4281_s2 + $0xb0] sm:$0xff] }
 0x1f2   :  { %v2493_v40 = vmul.f32 -1.442695, %v809_v38  ;;  %v810_v42 = vadd.f32 %v735_v39, %v4428_v41  ;;  %v812_v48 = vadd.f32 %v806_v46, %v4429_v47  ;;  %v3641_v38 = vld [vmem:[%s4281_s2 + $0xf8] sm:$0xff]  ;;  %v3648_v39 = vld [vmem:[%s4281_s2 + $0xe0] sm:$0xff]  ;;  %v3658_v41 = vld [vmem:[%s4281_s2 + $0xc8] sm:$0xff] }
 0x1f3   :  { %v3682_v46 = vld [vmem:[%s4281_s2 + $0xa8] sm:$0xff]  ;;  %v3687_v47 = vld [vmem:[%s4281_s2 + $0xb8] sm:$0xff] }
 0x1f4   :  { %2543 = vpow2.f32 %v2493_v40  ;;  %v2494_v44 = vmul.f32 -1.442695, %v810_v42  ;;  %v2495_v51 = vmul.f32 -1.442695, %v812_v48  ;;  %v3653_v40 = vld [vmem:[%s4281_s2 + $0xf0] sm:$0xff]  ;;  %v3665_v42 = vld [vmem:[%s4281_s2 + $0xd8] sm:$0xff] }
 0x1f5   :  { %v3694_v48 = vld [vmem:[%s4281_s2 + $0xa0] sm:$0xff] }
 0x1f6   :  { %2545 = vpow2.f32 %v2494_v44  ;;  %v3675_v44 = vld [vmem:[%s4281_s2 + $0xd0] sm:$0xff] }
 0x1f7   :  { %2547 = vtanh.f32 %v811_v50  ;;  %v3706_v50 = vld [vmem:[%s4281_s2 + $0x88] sm:$0xff] }
 0x1f8   :  { %2549 = vpow2.f32 %v2495_v51  ;;  %v3711_v51 = vld [vmem:[%s4281_s2 + $0x98] sm:$0xff] }
 0x201   :  { %v2544_v52 = vpop.eup %2543 }
 0x202   :  { %v816_v53 = vadd.f32 1.0, %v2544_v52  ;;  %v3718_v52 = vld [vmem:[%s4281_s2 + $0x80] sm:$0xff] }
 0x203   :  { %v2546_v55 = vpop.eup %2545  ;;  %4433 = vst [vmem:[#allocation9_spill] sm:$0xff] %v3718_v52 }
 0x204   :  { %2551 = vrcp.f32 %v816_v53  ;;  %v822_v56 = vadd.f32 1.0, %v2546_v55  ;;  %v2548_v57 = vpop.eup %2547  ;;  %v3723_v53 = vld [vmem:[%s4281_s2 + $0x90] sm:$0xff]  ;;  %v3730_v55 = vld [vmem:[%s4281_s2 + $0x68] sm:$0xff] }
 0x205   :  { %v2550_v58 = vpop.eup %2549  ;;  %4434 = vst [vmem:[#allocation10_spill] sm:$0xff] %v3723_v53  ;;  %4435 = vst [vmem:[#allocation11_spill] sm:$0xff] %v3730_v55 }
 0x206   :  { %2553 = vrcp.f32 %v822_v56  ;;  %v829_v7 = vadd.f32 1.0, %v2550_v58  ;;  %v3735_v56 = vld [vmem:[%s4281_s2 + $0x78] sm:$0xff]  ;;  %v3747_v58 = vld [vmem:[%s4281_s2 + $0x70] sm:$0xff] }
 0x207   :  { %4436 = vst [vmem:[#allocation12_spill] sm:$0xff] %v3735_v56  ;;  %4438 = vst [vmem:[#allocation14_spill] sm:$0xff] %v3747_v58 }
 0x208   :  { %2555 = vrcp.f32 %v829_v7  ;;  %v3771_v7 = vld [vmem:[%s4281_s2 + $0x50] sm:$0xff] }
 0x209   :  { %4442 = vst [vmem:[#allocation18_spill] sm:$0xff] %v3771_v7 }
 0x211   :  { %v2552_v3 = vpop.eup %2551 }
 0x212   :  { %v833_v63 = vmul.f32 %v2552_v3, %v2548_v57  ;;  %v3742_v57 = vld [vmem:[%s4281_s2 + $0x60] sm:$0xff]  ;;  %v3754_v3 = vld [vmem:[%s4281_s2 + $0x48] sm:$0xff] }
 0x213   :  { %v2554_v61 = vpop.eup %2553  ;;  %4437 = vst [vmem:[#allocation13_spill] sm:$0xff] %v3742_v57  ;;  %4439 = vst [vmem:[#allocation15_spill] sm:$0xff] %v3754_v3 }
 0x214   :  { %v832_v18 = vmul.f32 %v2554_v61, %v3359_v11  ;;  %v3482_v11 = vld [vmem:[%s4281_s2 + $0x1c0] sm:$0xff] }
 0x215   :  { %v2556_v5 = vpop.eup %2555  ;;  %v3766_v61 = vld [vmem:[%s4281_s2 + $0x40] sm:$0xff] }
 0x216   :  { %v3437_v45 = vadd.f32 %v833_v63, %v832_v18  ;;  %v3759_v63 = vld [vmem:[%s4281_s2 + $0x58] sm:$0xff]  ;;  %4441 = vst [vmem:[#allocation17_spill] sm:$0xff] %v3766_v61  ;;  %v3778_v18 = vld [vmem:[%s4281_s2 + $0x28] sm:$0xff] }
 0x217   :  { %4440 = vst [vmem:[#allocation16_spill] sm:$0xff] %v3759_v63  ;;  %4443 = vst [vmem:[#allocation19_spill] sm:$0xff] %v3778_v18 }
 0x218   :  { %2557 = vtanh.f32 %v3437_v45 }
 0x225   :  { %v2558_v27 = vpop.eup %2557 }
 0x226   :  { %v836_v36 = vmul.f32 %v2558_v27, %v2556_v5  ;;  %v3783_v5 = vld [vmem:[%s4281_s2 + $0x38] sm:$0xff]  ;;  %v3790_v27 = vld [vmem:[%s4281_s2 + $0x20] sm:$0xff] }
 0x227   :  { %4444 = vst [vmem:[#allocation20_spill] sm:$0xff] %v3783_v5  ;;  %4445 = vst [vmem:[#allocation21_spill] sm:$0xff] %v3790_v27 }
 0x228   :  { %975 = vmatmul.mubr.f32.vlgmr.msra.gmra.mxu0 %v836_v36  ;;  %1046 = vmatmul.mubr.f32.vlgmr.msra.gmra.mxu1 %v836_v36  ;;  %v2315_v2 = vmul.f32 %v3365_v54, %v836_v36  ;;  %v3795_v36 = vld [vmem:[%s4281_s2 + $0x30] sm:$0xff] }
 0x229   :  { %1217 = vmatprep.mubr.f32.mxu0 %v4425_v33  ;;  %1288 = vmatprep.mubr.f32.mxu1 %v4425_v33  ;;  %4446 = vst [vmem:[#allocation22_spill] sm:$0xff] %v3795_v36  ;;  %v3807_v33 = vld [vmem:[%s4281_s2 + $0x18] sm:$0xff] }
 0x22a   :  { %2324 = vadd.xlane.f32.xlu0 %v2315_v2  ;;  %1154 = vmatpush1.msra.mxu0 %v3458_v0  ;;  %v3802_v2 = vld [vmem:[%s4281_s2 + $0x8] sm:$0xff]  ;;  %4448 = vst [vmem:[#allocation24_spill] sm:$0xff] %v3807_v33 }
 0x22b   :  { %1225 = vmatpush1.msra.mxu1 %v3463_v62  ;;  %1155 = vmatprep.subr.mxu0 %v3470_v4  ;;  %4447 = vst [vmem:[#allocation23_spill] sm:$0xff] %v3802_v2 }
 0x22c   :  { %1226 = vmatprep.subr.mxu1 %v3475_v10  ;;  %1156 = vmatpush1.msra.mxu0 %v3482_v11 }
 0x22d   :  { %1227 = vmatpush1.msra.mxu1 %v3487_v60  ;;  %1157 = vmatprep.subr.mxu0 %v3494_v8 }
 0x22e   :  { %1228 = vmatprep.subr.mxu1 %v3499_v9  ;;  %1158 = vmatpush1.msra.mxu0 %v3506_v6 }
 0x22f   :  { %1229 = vmatpush1.msra.mxu1 %v3511_v12  ;;  %1159 = vmatprep.subr.mxu0 %v3518_v13 }
 0x230   :  { %1230 = vmatprep.subr.mxu1 %v3523_v14  ;;  %1160 = vmatpush1.msra.mxu0 %v3530_v15 }
 0x231   :  { %1231 = vmatpush1.msra.mxu1 %v3535_v16  ;;  %1161 = vmatprep.subr.mxu0 %v3542_v17 }
 0x232   :  { %1232 = vmatprep.subr.mxu1 %v3547_v19  ;;  %1162 = vmatpush1.msra.mxu0 %v3554_v20 }
 0x233   :  { %1233 = vmatpush1.msra.mxu1 %v3559_v21  ;;  %1163 = vmatprep.subr.mxu0 %v3566_v22 }
 0x234   :  { %1234 = vmatprep.subr.mxu1 %v3571_v23  ;;  %1164 = vmatpush1.msra.mxu0 %v3578_v24 }
 0x235   :  { %1235 = vmatpush1.msra.mxu1 %v3583_v25  ;;  %1165 = vmatprep.subr.mxu0 %v3590_v26 }
 0x236   :  { %1236 = vmatprep.subr.mxu1 %v3595_v28  ;;  %1166 = vmatpush1.msra.mxu0 %v3602_v29 }
 0x237   :  { %1237 = vmatpush1.msra.mxu1 %v3607_v30  ;;  %1167 = vmatprep.subr.mxu0 %v3614_v31 }
 0x238   :  { %1238 = vmatprep.subr.mxu1 %v3619_v32  ;;  %1168 = vmatpush1.msra.mxu0 %v3624_v34 }
 0x239   :  { %1239 = vmatpush1.msra.mxu1 %v3631_v35  ;;  %1169 = vmatprep.subr.mxu0 %v3636_v37 }
 0x23a   :  { %1240 = vmatprep.subr.mxu1 %v3641_v38  ;;  %1170 = vmatpush1.msra.mxu0 %v3648_v39 }
 0x23b   :  { %1241 = vmatpush1.msra.mxu1 %v3653_v40  ;;  %1171 = vmatprep.subr.mxu0 %v3658_v41 }
 0x23c   :  { %1242 = vmatprep.subr.mxu1 %v3665_v42  ;;  %1172 = vmatpush1.msra.mxu0 %v3670_v43 }
 0x23d   :  { %1243 = vmatpush1.msra.mxu1 %v3675_v44  ;;  %1173 = vmatprep.subr.mxu0 %v3682_v46 }
 0x23e   :  { %1244 = vmatprep.subr.mxu1 %v3687_v47  ;;  %1174 = vmatpush1.msra.mxu0 %v3694_v48 }
 0x23f   :  { %1245 = vmatpush1.msra.mxu1 %v3699_v49  ;;  %1175 = vmatprep.subr.mxu0 %v3706_v50 }
 0x240   :  { %1246 = vmatprep.subr.mxu1 %v3711_v51  ;;  %1176 = vmatpush1.msra.mxu0 %v3718_v52 }
 0x241   :  { %1247 = vmatpush1.msra.mxu1 %v3723_v53  ;;  %1177 = vmatprep.subr.mxu0 %v3730_v55  ;;  %v4454_v55 = vld [vmem:[#allocation33_spill] sm:$0xff] }
 0x242   :  { %1248 = vmatprep.subr.mxu1 %v3735_v56  ;;  %1178 = vmatpush1.msra.mxu0 %v3742_v57  ;;  %v4453_v56 = vld [vmem:[#allocation35_spill] sm:$0xff] }
 0x243   :  { %1249 = vmatpush1.msra.mxu1 %v3747_v58  ;;  %1179 = vmatprep.subr.mxu0 %v3754_v3 }
 0x244   :  { %1250 = vmatprep.subr.mxu1 %v3759_v63  ;;  %1180 = vmatpush1.msra.mxu0 %v3766_v61  ;;  %v3814_v61 = vld [vmem:[%s4281_s2] sm:$0xff] }
 0x245   :  { %1251 = vmatpush1.msra.mxu1 %v3771_v7  ;;  %1181 = vmatprep.subr.mxu0 %v3778_v18  ;;  %4449 = vst [vmem:[#allocation25_spill] sm:$0xff] %v3814_v61  ;;  %v3819_v7 = vld [vmem:[%s4281_s2 + $0x10] sm:$0xff] }
 0x246   :  { %1252 = vmatprep.subr.mxu1 %v3783_v5  ;;  %4450 = vst [vmem:[#allocation26_spill] sm:$0xff] %v3819_v7  ;;  %1182 = vmatpush1.msra.mxu0 %v3790_v27  ;;  %v4451_v18 = vld [vmem:[#allocation32_spill] sm:$0xff]  ;;  %v4452_v27 = vld [vmem:[#allocation34_spill] sm:$0xff] }
 0x247   :  { %1253 = vmatpush1.msra.mxu1 %v3795_v36  ;;  %1183 = vmatprep.subr.mxu0 %v3802_v2 }
 0x248   :  { %1254 = vmatprep.subr.mxu1 %v3807_v33  ;;  %1184 = vmatpush1.msra.mxu0 %v3814_v61 }
 0x249   :  { %1255 = vmatpush1.msra.mxu1 %v3819_v7  ;;  %1396 = vmatprep.subr.mxu0 %v3446_v1 }
 0x24a   :  { %1467 = vmatprep.subr.mxu1 %v3451_v59 }
 0x2e8   :  { %v976_v5 = vpop.f32.mrf.mxu0  ;;  %v1047_v36 = vpop.f32.mrf.mxu1 }
 0x2e9   :  { %v1052_v63 = vadd.f32 %v976_v5, %v4451_v18  ;;  %v1054_v7 = vadd.f32 %v1047_v36, %v4454_v55  ;;  %v4460_v36 = vld [vmem:[#allocation14_spill] sm:$0xff] }
 0x2ea   :  { %v978_v3 = vpop.f32.mrf.mxu0  ;;  %v1049_v33 = vpop.f32.mrf.mxu1 }
 0x2eb   :  { %v2496_v58 = vmul.f32 -1.442695, %v1052_v63  ;;  %v1053_v57 = vadd.f32 %v978_v3, %v4452_v27  ;;  %v1055_v61 = vadd.f32 %v1049_v33, %v4453_v56 }
 0x2ed   :  { %2559 = vpow2.f32 %v2496_v58  ;;  %v2497_v2 = vmul.f32 -1.442695, %v1053_v57  ;;  %v2498_v53 = vmul.f32 -1.442695, %v1055_v61  ;;  %v4458_v61 = vld [vmem:[#allocation12_spill] sm:$0xff] }
 0x2ef   :  { %2561 = vpow2.f32 %v2497_v2 }
 0x2f0   :  { %2563 = vtanh.f32 %v1054_v7  ;;  %v4459_v7 = vld [vmem:[#allocation13_spill] sm:$0xff] }
 0x2f1   :  { %2565 = vpow2.f32 %v2498_v53  ;;  %v4457_v53 = vld [vmem:[#allocation11_spill] sm:$0xff] }
 0x2fa   :  { %v2560_v1 = vpop.eup %2559 }
 0x2fb   :  { %v1059_v52 = vadd.f32 1.0, %v2560_v1 }
 0x2fc   :  { %v2562_v59 = vpop.eup %2561 }
 0x2fd   :  { %2567 = vrcp.f32 %v1059_v52  ;;  %v1065_v18 = vadd.f32 1.0, %v2562_v59  ;;  %v2564_v63 = vpop.eup %2563  ;;  %v4456_v52 = vld [vmem:[#allocation10_spill] sm:$0xff] }
 0x2fe   :  { %v2566_v3 = vpop.eup %2565 }
 0x2ff   :  { %2569 = vrcp.f32 %v1065_v18  ;;  %v1072_v27 = vadd.f32 1.0, %v2566_v3  ;;  %v4461_v18 = vld [vmem:[#allocation15_spill] sm:$0xff]  ;;  %v4463_v3 = vld [vmem:[#allocation17_spill] sm:$0xff] }
 0x301   :  { %2571 = vrcp.f32 %v1072_v27  ;;  %v4467_v27 = vld [vmem:[#allocation21_spill] sm:$0xff] }
 0x30a   :  { %v2568_v58 = vpop.eup %2567 }
 0x30b   :  { %v1076_v5 = vmul.f32 %v2568_v58, %v2564_v63  ;;  %v4462_v63 = vld [vmem:[#allocation16_spill] sm:$0xff]  ;;  %v4464_v58 = vld [vmem:[#allocation18_spill] sm:$0xff] }
 0x30c   :  { %v2570_v57 = vpop.eup %2569 }
 0x30d   :  { %v1075_v2 = vmul.f32 %v2570_v57, %v3437_v45  ;;  %v4455_v45 = vld [vmem:[#allocation9_spill] sm:$0xff]  ;;  %v4466_v57 = vld [vmem:[#allocation20_spill] sm:$0xff] }
 0x30e   :  { %v2572_v1 = vpop.eup %2571 }
 0x30f   :  { %v3834_v33 = vadd.f32 %v1076_v5, %v1075_v2  ;;  %v4465_v5 = vld [vmem:[#allocation19_spill] sm:$0xff]  ;;  %v4468_v2 = vld [vmem:[#allocation22_spill] sm:$0xff] }
 0x311   :  { %2573 = vtanh.f32 %v3834_v33 }
 0x31e   :  { %v2574_v55 = vpop.eup %2573 }
 0x31f   :  { %v1079_v56 = vmul.f32 %v2574_v55, %v2572_v1  ;;  %v4469_v1 = vld [vmem:[#allocation23_spill] sm:$0xff]  ;;  %v4470_v55 = vld [vmem:[#allocation24_spill] sm:$0xff] }
 0x321   :  { %1218 = vmatmul.mubr.f32.vlgmr.msra.gmra.mxu0 %v1079_v56  ;;  %1289 = vmatmul.mubr.f32.vlgmr.msra.gmra.mxu1 %v1079_v56  ;;  %v2316_v59 = vmul.f32 %v3365_v54, %v1079_v56  ;;  %v4471_v56 = vld [vmem:[#allocation25_spill] sm:$0xff] }
 0x322   :  { %1397 = vmatpush1.msra.mxu0 %v3458_v0  ;;  %1468 = vmatpush1.msra.mxu1 %v3463_v62 }
 0x323   :  { %2326 = vadd.xlane.f32.xlu1 %v2316_v59  ;;  %1398 = vmatprep.subr.mxu0 %v3470_v4  ;;  %v4472_v59 = vmov 0.0  }
 0x324   :  { %1469 = vmatprep.subr.mxu1 %v3475_v10  ;;  %1399 = vmatpush1.msra.mxu0 %v3482_v11 }
 0x325   :  { %1470 = vmatpush1.msra.mxu1 %v3487_v60  ;;  %1400 = vmatprep.subr.mxu0 %v3494_v8 }
 0x326   :  { %1471 = vmatprep.subr.mxu1 %v3499_v9  ;;  %1401 = vmatpush1.msra.mxu0 %v3506_v6 }
 0x327   :  { %1472 = vmatpush1.msra.mxu1 %v3511_v12  ;;  %1402 = vmatprep.subr.mxu0 %v3518_v13 }
 0x328   :  { %1473 = vmatprep.subr.mxu1 %v3523_v14  ;;  %1403 = vmatpush1.msra.mxu0 %v3530_v15 }
 0x329   :  { %1474 = vmatpush1.msra.mxu1 %v3535_v16  ;;  %1404 = vmatprep.subr.mxu0 %v3542_v17 }
 0x32a   :  { %1475 = vmatprep.subr.mxu1 %v3547_v19  ;;  %1405 = vmatpush1.msra.mxu0 %v3554_v20 }
 0x32b   :  { %1476 = vmatpush1.msra.mxu1 %v3559_v21  ;;  %1406 = vmatprep.subr.mxu0 %v3566_v22 }
 0x32c   :  { %1477 = vmatprep.subr.mxu1 %v3571_v23  ;;  %1407 = vmatpush1.msra.mxu0 %v3578_v24 }
 0x32d   :  { %1478 = vmatpush1.msra.mxu1 %v3583_v25  ;;  %1408 = vmatprep.subr.mxu0 %v3590_v26 }
 0x32e   :  { %1479 = vmatprep.subr.mxu1 %v3595_v28  ;;  %1409 = vmatpush1.msra.mxu0 %v3602_v29 }
 0x32f   :  { %1480 = vmatpush1.msra.mxu1 %v3607_v30  ;;  %1410 = vmatprep.subr.mxu0 %v3614_v31 }
 0x330   :  { %1481 = vmatprep.subr.mxu1 %v3619_v32  ;;  %1411 = vmatpush1.msra.mxu0 %v3624_v34 }
 0x331   :  { %1482 = vmatpush1.msra.mxu1 %v3631_v35  ;;  %1412 = vmatprep.subr.mxu0 %v3636_v37 }
 0x332   :  { %1483 = vmatprep.subr.mxu1 %v3641_v38  ;;  %1413 = vmatpush1.msra.mxu0 %v3648_v39 }
 0x333   :  { %1484 = vmatpush1.msra.mxu1 %v3653_v40  ;;  %1414 = vmatprep.subr.mxu0 %v3658_v41 }
 0x334   :  { %1485 = vmatprep.subr.mxu1 %v3665_v42  ;;  %1415 = vmatpush1.msra.mxu0 %v3670_v43 }
 0x335   :  { %1486 = vmatpush1.msra.mxu1 %v3675_v44  ;;  %1416 = vmatprep.subr.mxu0 %v3682_v46 }
 0x336   :  { %1487 = vmatprep.subr.mxu1 %v3687_v47  ;;  %1417 = vmatpush1.msra.mxu0 %v3694_v48 }
 0x337   :  { %1488 = vmatpush1.msra.mxu1 %v3699_v49  ;;  %1418 = vmatprep.subr.mxu0 %v3706_v50 }
 0x338   :  { %1489 = vmatprep.subr.mxu1 %v3711_v51  ;;  %1419 = vmatpush1.msra.mxu0 %v4455_v45 }
 0x339   :  { %1490 = vmatpush1.msra.mxu1 %v4456_v52  ;;  %1420 = vmatprep.subr.mxu0 %v4457_v53  ;;  %v4479_v53 = vld [vmem:[#allocation37_spill] sm:$0xff] }
 0x33a   :  { %1491 = vmatprep.subr.mxu1 %v4458_v61  ;;  %1421 = vmatpush1.msra.mxu0 %v4459_v7  ;;  %v4478_v61 = vld [vmem:[#allocation39_spill] sm:$0xff] }
 0x33b   :  { %1492 = vmatpush1.msra.mxu1 %v4460_v36  ;;  %1422 = vmatprep.subr.mxu0 %v4461_v18 }
 0x33c   :  { %1493 = vmatprep.subr.mxu1 %v4462_v63  ;;  %1423 = vmatpush1.msra.mxu0 %v4463_v3  ;;  %v4473_v63 = vld [vmem:[#allocation26_spill] sm:$0xff] }
 0x33d   :  { %1494 = vmatpush1.msra.mxu1 %v4464_v58  ;;  %1424 = vmatprep.subr.mxu0 %v4465_v5  ;;  %v4474_v58 = vld [vmem:[#allocation7_spill] sm:$0xff]  ;;  %v4475_v5 = vld [vmem:[#allocation8_spill] sm:$0xff] }
 0x33e   :  { %1495 = vmatprep.subr.mxu1 %v4466_v57  ;;  %1425 = vmatpush1.msra.mxu0 %v4467_v27  ;;  %v4476_v27 = vld [vmem:[#allocation36_spill] sm:$0xff] }
 0x33f   :  { %1496 = vmatpush1.msra.mxu1 %v4468_v2  ;;  %1426 = vmatprep.subr.mxu0 %v4469_v1  ;;  %v4477_v1 = vld [vmem:[#allocation38_spill] sm:$0xff] }
 0x340   :  { %1497 = vmatprep.subr.mxu1 %v4470_v55  ;;  %1427 = vmatpush1.msra.mxu0 %v4471_v56 }
 0x341   :  { %1460 = vmatprep.mubr.f32.mxu0 %v4472_v59  ;;  %1498 = vmatpush1.msra.mxu1 %v4473_v63 }
 0x342   :  { %1531 = vmatprep.mubr.f32.mxu1 %v4472_v59  ;;  %1639 = vmatprep.subr.mxu0 %v4474_v58 }
 0x343   :  { %1710 = vmatprep.subr.mxu1 %v4475_v5 }
 0x3e1   :  { %v1219_v57 = vpop.f32.mrf.mxu0  ;;  %v1290_v55 = vpop.f32.mrf.mxu1 }
 0x3e2   :  { %v1295_v3 = vadd.f32 %v1219_v57, %v4476_v27  ;;  %v1297_v59 = vadd.f32 %v1290_v55, %v4479_v53  ;;  %v4484_v55 = vld [vmem:[#allocation13_spill] sm:$0xff] }
 0x3e3   :  { %v1221_v2 = vpop.f32.mrf.mxu0  ;;  %v1292_v7 = vpop.f32.mrf.mxu1 }
 0x3e4   :  { %v2499_v18 = vmul.f32 -1.442695, %v1295_v3  ;;  %v1296_v36 = vadd.f32 %v1221_v2, %v4477_v1  ;;  %v1298_v63 = vadd.f32 %v1292_v7, %v4478_v61 }
 0x3e6   :  { %2575 = vpow2.f32 %v2499_v18  ;;  %v2500_v56 = vmul.f32 -1.442695, %v1296_v36  ;;  %v2501_v52 = vmul.f32 -1.442695, %v1298_v63 }
 0x3e8   :  { %2577 = vpow2.f32 %v2500_v56 }
 0x3e9   :  { %2579 = vtanh.f32 %v1297_v59  ;;  %v4485_v59 = vld [vmem:[#allocation14_spill] sm:$0xff] }
 0x3ea   :  { %2581 = vpow2.f32 %v2501_v52  ;;  %v4481_v52 = vld [vmem:[#allocation10_spill] sm:$0xff] }
 0x3f3   :  { %v2576_v58 = vpop.eup %2575 }
 0x3f4   :  { %v1302_v45 = vadd.f32 1.0, %v2576_v58  ;;  %v4482_v58 = vld [vmem:[#allocation11_spill] sm:$0xff] }
 0x3f5   :  { %v2578_v5 = vpop.eup %2577 }
 0x3f6   :  { %2583 = vrcp.f32 %v1302_v45  ;;  %v1308_v57 = vadd.f32 1.0, %v2578_v5  ;;  %v2580_v3 = vpop.eup %2579  ;;  %v4483_v5 = vld [vmem:[#allocation12_spill] sm:$0xff] }
 0x3f7   :  { %v2582_v27 = vpop.eup %2581 }
 0x3f8   :  { %2585 = vrcp.f32 %v1308_v57  ;;  %v1315_v1 = vadd.f32 1.0, %v2582_v27  ;;  %v4486_v57 = vld [vmem:[#allocation15_spill] sm:$0xff]  ;;  %v4488_v27 = vld [vmem:[#allocation17_spill] sm:$0xff] }
 0x3fa   :  { %2587 = vrcp.f32 %v1315_v1  ;;  %v4492_v1 = vld [vmem:[#allocation21_spill] sm:$0xff] }
 0x403   :  { %v2584_v18 = vpop.eup %2583 }
 0x404   :  { %v1319_v2 = vmul.f32 %v2584_v18, %v2580_v3  ;;  %v4487_v3 = vld [vmem:[#allocation16_spill] sm:$0xff]  ;;  %v4489_v18 = vld [vmem:[#allocation18_spill] sm:$0xff] }
 0x405   :  { %v2586_v36 = vpop.eup %2585 }
 0x406   :  { %v1318_v56 = vmul.f32 %v2586_v36, %v3834_v33  ;;  %v4480_v33 = vld [vmem:[#allocation9_spill] sm:$0xff]  ;;  %v4491_v36 = vld [vmem:[#allocation20_spill] sm:$0xff] }
 0x407   :  { %v2588_v53 = vpop.eup %2587 }
 0x408   :  { %v3909_v61 = vadd.f32 %v1319_v2, %v1318_v56  ;;  %v4490_v2 = vld [vmem:[#allocation19_spill] sm:$0xff]  ;;  %v4493_v56 = vld [vmem:[#allocation22_spill] sm:$0xff] }
 0x40a   :  { %2589 = vtanh.f32 %v3909_v61 }
 0x417   :  { %v2590_v7 = vpop.eup %2589 }
 0x418   :  { %v1322_v63 = vmul.f32 %v2590_v7, %v2588_v53  ;;  %v4494_v53 = vld [vmem:[#allocation23_spill] sm:$0xff]  ;;  %v4495_v7 = vld [vmem:[#allocation24_spill] sm:$0xff] }
 0x41a   :  { %1461 = vmatmul.mubr.f32.vlgmr.msra.gmra.mxu0 %v1322_v63  ;;  %1532 = vmatmul.mubr.f32.vlgmr.msra.gmra.mxu1 %v1322_v63  ;;  %v2317_v45 = vmul.f32 %v3365_v54, %v1322_v63  ;;  %v4496_v63 = vld [vmem:[#allocation25_spill] sm:$0xff] }
 0x41b   :  { %1640 = vmatpush1.msra.mxu0 %v3458_v0  ;;  %1711 = vmatpush1.msra.mxu1 %v3463_v62 }
 0x41c   :  { %2328 = vadd.xlane.f32.xlu1 %v2317_v45  ;;  %1641 = vmatprep.subr.mxu0 %v3470_v4  ;;  %v4497_v45 = vmov 0.0  }
 0x41d   :  { %1712 = vmatprep.subr.mxu1 %v3475_v10  ;;  %1642 = vmatpush1.msra.mxu0 %v3482_v11 }
 0x41e   :  { %1713 = vmatpush1.msra.mxu1 %v3487_v60  ;;  %1643 = vmatprep.subr.mxu0 %v3494_v8 }
 0x41f   :  { %1714 = vmatprep.subr.mxu1 %v3499_v9  ;;  %1644 = vmatpush1.msra.mxu0 %v3506_v6 }
 0x420   :  { %1715 = vmatpush1.msra.mxu1 %v3511_v12  ;;  %1645 = vmatprep.subr.mxu0 %v3518_v13 }
 0x421   :  { %1716 = vmatprep.subr.mxu1 %v3523_v14  ;;  %1646 = vmatpush1.msra.mxu0 %v3530_v15 }
 0x422   :  { %1717 = vmatpush1.msra.mxu1 %v3535_v16  ;;  %1647 = vmatprep.subr.mxu0 %v3542_v17 }
 0x423   :  { %1718 = vmatprep.subr.mxu1 %v3547_v19  ;;  %1648 = vmatpush1.msra.mxu0 %v3554_v20 }
 0x424   :  { %1719 = vmatpush1.msra.mxu1 %v3559_v21  ;;  %1649 = vmatprep.subr.mxu0 %v3566_v22 }
 0x425   :  { %1720 = vmatprep.subr.mxu1 %v3571_v23  ;;  %1650 = vmatpush1.msra.mxu0 %v3578_v24 }
 0x426   :  { %1721 = vmatpush1.msra.mxu1 %v3583_v25  ;;  %1651 = vmatprep.subr.mxu0 %v3590_v26 }
 0x427   :  { %1722 = vmatprep.subr.mxu1 %v3595_v28  ;;  %1652 = vmatpush1.msra.mxu0 %v3602_v29 }
 0x428   :  { %1723 = vmatpush1.msra.mxu1 %v3607_v30  ;;  %1653 = vmatprep.subr.mxu0 %v3614_v31 }
 0x429   :  { %1724 = vmatprep.subr.mxu1 %v3619_v32  ;;  %1654 = vmatpush1.msra.mxu0 %v3624_v34 }
 0x42a   :  { %1725 = vmatpush1.msra.mxu1 %v3631_v35  ;;  %1655 = vmatprep.subr.mxu0 %v3636_v37 }
 0x42b   :  { %1726 = vmatprep.subr.mxu1 %v3641_v38  ;;  %1656 = vmatpush1.msra.mxu0 %v3648_v39 }
 0x42c   :  { %1727 = vmatpush1.msra.mxu1 %v3653_v40  ;;  %1657 = vmatprep.subr.mxu0 %v3658_v41 }
 0x42d   :  { %1728 = vmatprep.subr.mxu1 %v3665_v42  ;;  %1658 = vmatpush1.msra.mxu0 %v3670_v43 }
 0x42e   :  { %1729 = vmatpush1.msra.mxu1 %v3675_v44  ;;  %1659 = vmatprep.subr.mxu0 %v3682_v46 }
 0x42f   :  { %1730 = vmatprep.subr.mxu1 %v3687_v47  ;;  %1660 = vmatpush1.msra.mxu0 %v3694_v48 }
 0x430   :  { %1731 = vmatpush1.msra.mxu1 %v3699_v49  ;;  %1661 = vmatprep.subr.mxu0 %v3706_v50 }
 0x431   :  { %1732 = vmatprep.subr.mxu1 %v3711_v51  ;;  %1662 = vmatpush1.msra.mxu0 %v4480_v33 }
 0x432   :  { %1733 = vmatpush1.msra.mxu1 %v4481_v52  ;;  %1663 = vmatprep.subr.mxu0 %v4482_v58  ;;  %v4504_v58 = vld [vmem:[#allocation41_spill] sm:$0xff] }
 0x433   :  { %1734 = vmatprep.subr.mxu1 %v4483_v5  ;;  %1664 = vmatpush1.msra.mxu0 %v4484_v55  ;;  %v4503_v5 = vld [vmem:[#allocation43_spill] sm:$0xff] }
 0x434   :  { %1735 = vmatpush1.msra.mxu1 %v4485_v59  ;;  %1665 = vmatprep.subr.mxu0 %v4486_v57 }
 0x435   :  { %1736 = vmatprep.subr.mxu1 %v4487_v3  ;;  %1666 = vmatpush1.msra.mxu0 %v4488_v27  ;;  %v4498_v3 = vld [vmem:[#allocation26_spill] sm:$0xff] }
 0x436   :  { %1737 = vmatpush1.msra.mxu1 %v4489_v18  ;;  %1667 = vmatprep.subr.mxu0 %v4490_v2  ;;  %v4499_v18 = vld [vmem:[#allocation7_spill] sm:$0xff]  ;;  %v4500_v2 = vld [vmem:[#allocation8_spill] sm:$0xff] }
 0x437   :  { %1738 = vmatprep.subr.mxu1 %v4491_v36  ;;  %1668 = vmatpush1.msra.mxu0 %v4492_v1  ;;  %v4501_v1 = vld [vmem:[#allocation40_spill] sm:$0xff] }
 0x438   :  { %1739 = vmatpush1.msra.mxu1 %v4493_v56  ;;  %1669 = vmatprep.subr.mxu0 %v4494_v53  ;;  %v4502_v53 = vld [vmem:[#allocation42_spill] sm:$0xff] }
 0x439   :  { %1740 = vmatprep.subr.mxu1 %v4495_v7  ;;  %1670 = vmatpush1.msra.mxu0 %v4496_v63 }
 0x43a   :  { %1703 = vmatprep.mubr.f32.mxu0 %v4497_v45  ;;  %1741 = vmatpush1.msra.mxu1 %v4498_v3 }
 0x43b   :  { %1774 = vmatprep.mubr.f32.mxu1 %v4497_v45  ;;  %1882 = vmatprep.subr.mxu0 %v4499_v18 }
 0x43c   :  { %1953 = vmatprep.subr.mxu1 %v4500_v2 }
 0x4da   :  { %v1462_v36 = vpop.f32.mrf.mxu0  ;;  %v1533_v7 = vpop.f32.mrf.mxu1 }
 0x4db   :  { %v1538_v27 = vadd.f32 %v1462_v36, %v4501_v1  ;;  %v1540_v45 = vadd.f32 %v1533_v7, %v4504_v58 }
 0x4dc   :  { %v1464_v56 = vpop.f32.mrf.mxu0  ;;  %v1535_v55 = vpop.f32.mrf.mxu1 }
 0x4dd   :  { %v2502_v57 = vmul.f32 -1.442695, %v1538_v27  ;;  %v1539_v59 = vadd.f32 %v1464_v56, %v4502_v53  ;;  %v1541_v3 = vadd.f32 %v1535_v55, %v4503_v5 }
 0x4df   :  { %2591 = vpow2.f32 %v2502_v57  ;;  %v2503_v63 = vmul.f32 -1.442695, %v1539_v59  ;;  %v2504_v52 = vmul.f32 -1.442695, %v1541_v3 }
 0x4e1   :  { %2593 = vpow2.f32 %v2503_v63 }
 0x4e2   :  { %2595 = vtanh.f32 %v1540_v45 }
 0x4e3   :  { %2597 = vpow2.f32 %v2504_v52 }
 0x4ec   :  { %v2592_v18 = vpop.eup %2591 }
 0x4ed   :  { %v1545_v33 = vadd.f32 1.0, %v2592_v18  ;;  %v4063_v18 = vld [vmem:[%s4283_s4] ss:$0 sm:$0xff] }
 0x4ee   :  { %v2594_v2 = vpop.eup %2593 }
 0x4ef   :  { %2599 = vrcp.f32 %v1545_v33  ;;  %v1551_v36 = vadd.f32 1.0, %v2594_v2  ;;  %v2596_v27 = vpop.eup %2595 }
 0x4f0   :  { %v2598_v1 = vpop.eup %2597 }
 0x4f1   :  { %2601 = vrcp.f32 %v1551_v36  ;;  %v1558_v53 = vadd.f32 1.0, %v2598_v1  ;;  %v2122_v36 = vld [vmem:[%s4281_s2 + $0x1e8] sm:$0xff]  ;;  %v2121_v1 = vld [vmem:[%s4281_s2 + $0x1e0] sm:$0xff] }
 0x4f3   :  { %2603 = vrcp.f32 %v1558_v53  ;;  %v2117_v53 = vld [vmem:[%s4281_s2 + $0x1c0] sm:$0xff] }
 0x4fc   :  { %v2600_v57 = vpop.eup %2599 }
 0x4fd   :  { %v1562_v56 = vmul.f32 %v2600_v57, %v2596_v27  ;;  %v2124_v27 = vld [vmem:[%s4281_s2 + $0x1f8] sm:$0xff]  ;;  %v2123_v57 = vld [vmem:[%s4281_s2 + $0x1f0] sm:$0xff] }
 0x4fe   :  { %v2602_v59 = vpop.eup %2601 }
 0x4ff   :  { %v1561_v63 = vmul.f32 %v2602_v59, %v3909_v61  ;;  %v2120_v59 = vld [vmem:[%s4281_s2 + $0x1d8] sm:$0xff] }
 0x500   :  { %v2604_v58 = vpop.eup %2603 }
 0x501   :  { %v3984_v5 = vadd.f32 %v1562_v56, %v1561_v63  ;;  %v2118_v56 = vld [vmem:[%s4281_s2 + $0x1c8] sm:$0xff]  ;;  %v2119_v63 = vld [vmem:[%s4281_s2 + $0x1d0] sm:$0xff] }
 0x503   :  { %2605 = vtanh.f32 %v3984_v5 }
 0x510   :  { %v2606_v55 = vpop.eup %2605 }
 0x511   :  { %v1565_v3 = vmul.f32 %v2606_v55, %v2604_v58  ;;  %v2116_v58 = vld [vmem:[%s4281_s2 + $0x1b8] sm:$0xff]  ;;  %v2113_v55 = vld [vmem:[%s4281_s2 + $0x1a0] sm:$0xff] }
 0x513   :  { %1704 = vmatmul.mubr.f32.vlgmr.msra.gmra.mxu0 %v1565_v3  ;;  %1775 = vmatmul.mubr.f32.vlgmr.msra.gmra.mxu1 %v1565_v3  ;;  %v2318_v33 = vmul.f32 %v3365_v54, %v1565_v3  ;;  %v4505_v54 = vld [vmem:[#allocation9_spill] sm:$0xff] }
 0x514   :  { %1883 = vmatpush1.msra.mxu0 %v3458_v0  ;;  %1954 = vmatpush1.msra.mxu1 %v3463_v62  ;;  %v4506_v0 = vld [vmem:[#allocation10_spill] sm:$0xff]  ;;  %v4507_v62 = vld [vmem:[#allocation11_spill] sm:$0xff]  ;;  %v2115_v3 = vld [vmem:[%s4281_s2 + $0x1b0] sm:$0xff] }
 0x515   :  { %2330 = vadd.xlane.f32.xlu0 %v2318_v33  ;;  %1884 = vmatprep.subr.mxu0 %v3470_v4  ;;  %v4508_v4 = vld [vmem:[#allocation12_spill] sm:$0xff] }
 0x516   :  { %1955 = vmatprep.subr.mxu1 %v3475_v10  ;;  %1885 = vmatpush1.msra.mxu0 %v3482_v11  ;;  %v4509_v10 = vld [vmem:[#allocation13_spill] sm:$0xff]  ;;  %v4510_v11 = vld [vmem:[#allocation14_spill] sm:$0xff]  ;;  %v2110_v33 = vld [vmem:[%s4281_s2 + $0x188] sm:$0xff] }
 0x517   :  { %1956 = vmatpush1.msra.mxu1 %v3487_v60  ;;  %1886 = vmatprep.subr.mxu0 %v3494_v8  ;;  %v4511_v60 = vld [vmem:[#allocation15_spill] sm:$0xff]  ;;  %v4512_v8 = vld [vmem:[#allocation16_spill] sm:$0xff] }
 0x518   :  { %1957 = vmatprep.subr.mxu1 %v3499_v9  ;;  %1887 = vmatpush1.msra.mxu0 %v3506_v6  ;;  %v4513_v9 = vld [vmem:[#allocation17_spill] sm:$0xff]  ;;  %v4514_v6 = vld [vmem:[#allocation18_spill] sm:$0xff] }
 0x519   :  { %1958 = vmatpush1.msra.mxu1 %v3511_v12  ;;  %1888 = vmatprep.subr.mxu0 %v3518_v13  ;;  %v4515_v12 = vld [vmem:[#allocation19_spill] sm:$0xff]  ;;  %v4516_v13 = vld [vmem:[#allocation20_spill] sm:$0xff] }
 0x51a   :  { %1959 = vmatprep.subr.mxu1 %v3523_v14  ;;  %1889 = vmatpush1.msra.mxu0 %v3530_v15  ;;  %v4517_v14 = vld [vmem:[#allocation21_spill] sm:$0xff]  ;;  %v4518_v15 = vld [vmem:[#allocation22_spill] sm:$0xff] }
 0x51b   :  { %1960 = vmatpush1.msra.mxu1 %v3535_v16  ;;  %1890 = vmatprep.subr.mxu0 %v3542_v17  ;;  %v4519_v16 = vld [vmem:[#allocation23_spill] sm:$0xff]  ;;  %v4520_v17 = vld [vmem:[#allocation24_spill] sm:$0xff] }
 0x51c   :  { %1961 = vmatprep.subr.mxu1 %v3547_v19  ;;  %1891 = vmatpush1.msra.mxu0 %v3554_v20  ;;  %v4521_v19 = vld [vmem:[#allocation25_spill] sm:$0xff]  ;;  %v4522_v20 = vmov 0.0  }
 0x51d   :  { %1962 = vmatpush1.msra.mxu1 %v3559_v21  ;;  %1892 = vmatprep.subr.mxu0 %v3566_v22  ;;  %v4523_v21 = vld [vmem:[#allocation26_spill] sm:$0xff] }
 0x51e   :  { %1963 = vmatprep.subr.mxu1 %v3571_v23  ;;  %1893 = vmatpush1.msra.mxu0 %v3578_v24  ;;  %v4524_v23 = vld [vmem:[#allocation44_spill] sm:$0xff] }
 0x51f   :  { %1964 = vmatpush1.msra.mxu1 %v3583_v25  ;;  %1894 = vmatprep.subr.mxu0 %v3590_v26 }
 0x520   :  { %1965 = vmatprep.subr.mxu1 %v3595_v28  ;;  %1895 = vmatpush1.msra.mxu0 %v3602_v29  ;;  %v4525_v28 = vld [vmem:[#allocation46_spill] sm:$0xff] }
 0x521   :  { %1966 = vmatpush1.msra.mxu1 %v3607_v30  ;;  %1896 = vmatprep.subr.mxu0 %v3614_v31 }
 0x522   :  { %1967 = vmatprep.subr.mxu1 %v3619_v32  ;;  %1897 = vmatpush1.msra.mxu0 %v3624_v34  ;;  %v4526_v34 = vld [vmem:[#allocation47_spill] sm:$0xff] }
 0x523   :  { %1968 = vmatpush1.msra.mxu1 %v3631_v35  ;;  %1898 = vmatprep.subr.mxu0 %v3636_v37  ;;  %v4527_v37 = vld [vmem:[#allocation45_spill] sm:$0xff] }
 0x524   :  { %1969 = vmatprep.subr.mxu1 %v3641_v38  ;;  %1899 = vmatpush1.msra.mxu0 %v3648_v39 }
 0x525   :  { %1970 = vmatpush1.msra.mxu1 %v3653_v40  ;;  %1900 = vmatprep.subr.mxu0 %v3658_v41 }
 0x526   :  { %1971 = vmatprep.subr.mxu1 %v3665_v42  ;;  %1901 = vmatpush1.msra.mxu0 %v3670_v43 }
 0x527   :  { %1972 = vmatpush1.msra.mxu1 %v3675_v44  ;;  %1902 = vmatprep.subr.mxu0 %v3682_v46 }
 0x528   :  { %1973 = vmatprep.subr.mxu1 %v3687_v47  ;;  %1903 = vmatpush1.msra.mxu0 %v3694_v48 }
 0x529   :  { %1974 = vmatpush1.msra.mxu1 %v3699_v49  ;;  %1904 = vmatprep.subr.mxu0 %v3706_v50 }
 0x52a   :  { %1975 = vmatprep.subr.mxu1 %v3711_v51  ;;  %1905 = vmatpush1.msra.mxu0 %v4505_v54  ;;  %v2112_v54 = vld [vmem:[%s4281_s2 + $0x198] sm:$0xff] }
 0x52b   :  { %1976 = vmatpush1.msra.mxu1 %v4506_v0  ;;  %1906 = vmatprep.subr.mxu0 %v4507_v62  ;;  %v2109_v0 = vld [vmem:[%s4281_s2 + $0x180] sm:$0xff]  ;;  %v2111_v62 = vld [vmem:[%s4281_s2 + $0x190] sm:$0xff] }
 0x52c   :  { %1977 = vmatprep.subr.mxu1 %v4508_v4  ;;  %1907 = vmatpush1.msra.mxu0 %v4509_v10  ;;  %v2106_v4 = vld [vmem:[%s4281_s2 + $0x168] sm:$0xff]  ;;  %v2108_v10 = vld [vmem:[%s4281_s2 + $0x178] sm:$0xff] }
 0x52d   :  { %1978 = vmatpush1.msra.mxu1 %v4510_v11  ;;  %1908 = vmatprep.subr.mxu0 %v4511_v60  ;;  %v2105_v11 = vld [vmem:[%s4281_s2 + $0x160] sm:$0xff]  ;;  %v2107_v60 = vld [vmem:[%s4281_s2 + $0x170] sm:$0xff] }
 0x52e   :  { %1979 = vmatprep.subr.mxu1 %v4512_v8  ;;  %1909 = vmatpush1.msra.mxu0 %v4513_v9  ;;  %v2102_v8 = vld [vmem:[%s4281_s2 + $0x148] sm:$0xff]  ;;  %v2104_v9 = vld [vmem:[%s4281_s2 + $0x158] sm:$0xff] }
 0x52f   :  { %1980 = vmatpush1.msra.mxu1 %v4514_v6  ;;  %1910 = vmatprep.subr.mxu0 %v4515_v12  ;;  %v2101_v6 = vld [vmem:[%s4281_s2 + $0x140] sm:$0xff]  ;;  %v2103_v12 = vld [vmem:[%s4281_s2 + $0x150] sm:$0xff] }
 0x530   :  { %1981 = vmatprep.subr.mxu1 %v4516_v13  ;;  %1911 = vmatpush1.msra.mxu0 %v4517_v14  ;;  %v2098_v13 = vld [vmem:[%s4281_s2 + $0x128] sm:$0xff]  ;;  %v2100_v14 = vld [vmem:[%s4281_s2 + $0x138] sm:$0xff] }
 0x531   :  { %1982 = vmatpush1.msra.mxu1 %v4518_v15  ;;  %1912 = vmatprep.subr.mxu0 %v4519_v16  ;;  %v2097_v15 = vld [vmem:[%s4281_s2 + $0x120] sm:$0xff]  ;;  %v2099_v16 = vld [vmem:[%s4281_s2 + $0x130] sm:$0xff] }
 0x532   :  { %1983 = vmatprep.subr.mxu1 %v4520_v17  ;;  %1913 = vmatpush1.msra.mxu0 %v4521_v19  ;;  %v2094_v17 = vld [vmem:[%s4281_s2 + $0x108] sm:$0xff]  ;;  %v2096_v19 = vld [vmem:[%s4281_s2 + $0x118] sm:$0xff] }
 0x533   :  { %1946 = vmatprep.mubr.f32.mxu0 %v4522_v20  ;;  %1984 = vmatpush1.msra.mxu1 %v4523_v21  ;;  %v2095_v21 = vld [vmem:[%s4281_s2 + $0x110] sm:$0xff] }
 0x534   :  { %2017 = vmatprep.mubr.f32.mxu1 %v4522_v20  ;;  %2125 = vmatprep.subr.mxu0 %v2122_v36  ;;  %v2061_v36 = vld [vmem:[%s4281_s2] sm:$0xff] }
 0x535   :  { %2196 = vmatprep.subr.mxu1 %v2124_v27  ;;  %v2063_v27 = vld [vmem:[%s4281_s2 + $0x10] sm:$0xff] }
 0x5d3   :  { %v1705_v22 = vpop.f32.mrf.mxu0  ;;  %v1776_v30 = vpop.f32.mrf.mxu1 }
 0x5d4   :  { %v1781_v24 = vadd.f32 %v1705_v22, %v4524_v23  ;;  %v1783_v38 = vadd.f32 %v1776_v30, %v4527_v37  ;;  %v2090_v22 = vld [vmem:[%s4281_s2 + $0xe8] sm:$0xff]  ;;  %v2092_v23 = vld [vmem:[%s4281_s2 + $0xf8] sm:$0xff]  ;;  %v2087_v30 = vld [vmem:[%s4281_s2 + $0xd0] sm:$0xff] }
 0x5d5   :  { %v1707_v25 = vpop.f32.mrf.mxu0  ;;  %v1778_v32 = vpop.f32.mrf.mxu1  ;;  %v2078_v37 = vld [vmem:[%s4281_s2 + $0x88] sm:$0xff] }
 0x5d6   :  { %v2505_v26 = vmul.f32 -1.442695, %v1781_v24  ;;  %v1782_v29 = vadd.f32 %v1707_v25, %v4525_v28  ;;  %v1784_v35 = vadd.f32 %v1778_v32, %v4526_v34  ;;  %v2089_v24 = vld [vmem:[%s4281_s2 + $0xe0] sm:$0xff]  ;;  %v2091_v25 = vld [vmem:[%s4281_s2 + $0xf0] sm:$0xff]  ;;  %v2088_v28 = vld [vmem:[%s4281_s2 + $0xd8] sm:$0xff] }
 0x5d7   :  { %v2084_v32 = vld [vmem:[%s4281_s2 + $0xb8] sm:$0xff]  ;;  %v2081_v34 = vld [vmem:[%s4281_s2 + $0xa0] sm:$0xff] }
 0x5d8   :  { %2607 = vpow2.f32 %v2505_v26  ;;  %v2506_v31 = vmul.f32 -1.442695, %v1782_v29  ;;  %v2507_v39 = vmul.f32 -1.442695, %v1784_v35  ;;  %v2086_v26 = vld [vmem:[%s4281_s2 + $0xc8] sm:$0xff]  ;;  %v2085_v29 = vld [vmem:[%s4281_s2 + $0xc0] sm:$0xff] }
 0x5d9   :  { %v2083_v35 = vld [vmem:[%s4281_s2 + $0xb0] sm:$0xff] }
 0x5da   :  { %2609 = vpow2.f32 %v2506_v31  ;;  %v2082_v31 = vld [vmem:[%s4281_s2 + $0xa8] sm:$0xff] }
 0x5db   :  { %2611 = vtanh.f32 %v1783_v38  ;;  %v2080_v38 = vld [vmem:[%s4281_s2 + $0x98] sm:$0xff] }
 0x5dc   :  { %2613 = vpow2.f32 %v2507_v39  ;;  %v2077_v39 = vld [vmem:[%s4281_s2 + $0x80] sm:$0xff] }
 0x5e5   :  { %v2608_v40 = vpop.eup %2607 }
 0x5e6   :  { %v1788_v41 = vadd.f32 1.0, %v2608_v40  ;;  %v2079_v40 = vld [vmem:[%s4281_s2 + $0x90] sm:$0xff] }
 0x5e7   :  { %v2610_v42 = vpop.eup %2609 }
 0x5e8   :  { %2615 = vrcp.f32 %v1788_v41  ;;  %v1794_v43 = vadd.f32 1.0, %v2610_v42  ;;  %v2612_v44 = vpop.eup %2611  ;;  %v2074_v41 = vld [vmem:[%s4281_s2 + $0x68] sm:$0xff]  ;;  %v2076_v42 = vld [vmem:[%s4281_s2 + $0x78] sm:$0xff] }
 0x5e9   :  { %v2614_v46 = vpop.eup %2613 }
 0x5ea   :  { %2617 = vrcp.f32 %v1794_v43  ;;  %v1801_v50 = vadd.f32 1.0, %v2614_v46  ;;  %v2073_v43 = vld [vmem:[%s4281_s2 + $0x60] sm:$0xff]  ;;  %v2070_v46 = vld [vmem:[%s4281_s2 + $0x48] sm:$0xff] }
 0x5ec   :  { %2619 = vrcp.f32 %v1801_v50  ;;  %v2066_v50 = vld [vmem:[%s4281_s2 + $0x28] sm:$0xff] }
 0x5f5   :  { %v2616_v47 = vpop.eup %2615 }
 0x5f6   :  { %v1805_v48 = vmul.f32 %v2616_v47, %v2612_v44  ;;  %v2075_v44 = vld [vmem:[%s4281_s2 + $0x70] sm:$0xff]  ;;  %v2072_v47 = vld [vmem:[%s4281_s2 + $0x58] sm:$0xff] }
 0x5f7   :  { %v2618_v49 = vpop.eup %2617 }
 0x5f8   :  { %v1804_v51 = vmul.f32 %v2618_v49, %v3984_v5  ;;  %v2114_v5 = vld [vmem:[%s4281_s2 + $0x1a8] sm:$0xff]  ;;  %v2071_v49 = vld [vmem:[%s4281_s2 + $0x50] sm:$0xff] }
 0x5f9   :  { %v2620_v52 = vpop.eup %2619 }
 0x5fa   :  { %v4057_v61 = vadd.f32 %v1805_v48, %v1804_v51  ;;  %v2069_v48 = vld [vmem:[%s4281_s2 + $0x40] sm:$0xff]  ;;  %v2068_v51 = vld [vmem:[%s4281_s2 + $0x38] sm:$0xff] }
 0x5fc   :  { %2621 = vtanh.f32 %v4057_v61 }
 0x609   :  { %v2622_v7 = vpop.eup %2621 }
 0x60a   :  { %v1808_v45 = vmul.f32 %v2622_v7, %v2620_v52  ;;  %v2065_v52 = vld [vmem:[%s4281_s2 + $0x20] sm:$0xff]  ;;  %v2067_v7 = vld [vmem:[%s4281_s2 + $0x30] sm:$0xff] }
 0x60c   :  { %1947 = vmatmul.mubr.f32.vlgmr.msra.gmra.mxu0 %v1808_v45  ;;  %2018 = vmatmul.mubr.f32.vlgmr.msra.gmra.mxu1 %v1808_v45  ;;  %v2319_v2 = vmul.f32 %v4063_v18, %v1808_v45  ;;  %v2062_v45 = vld [vmem:[%s4281_s2 + $0x8] sm:$0xff] }
 0x60d   :  { %2189 = vmatprep.mubr.f32.mxu0 %v4522_v20  ;;  %2260 = vmatprep.mubr.f32.mxu1 %v4522_v20  ;;  %v2093_v20 = vld [vmem:[%s4281_s2 + $0x100] sm:$0xff] }
 0x60e   :  { %2332 = vadd.xlane.f32.xlu1 %v2319_v2  ;;  %2126 = vmatpush1.msra.mxu0 %v2121_v1  ;;  %v2064_v2 = vld [vmem:[%s4281_s2 + $0x18] sm:$0xff]  ;;  %v2689_v1 = vmov 0  }
 0x60f   :  { %2197 = vmatpush1.msra.mxu1 %v2123_v57  ;;  %2127 = vmatprep.subr.mxu0 %v2118_v56  ;;  %v11_v57 = vstv %s4284_s5 }
 0x610   :  { %2198 = vmatprep.subr.mxu1 %v2120_v59  ;;  %2128 = vmatpush1.msra.mxu0 %v2117_v53  ;;  %12 = vst [vmem:[#allocation6] sm:$0x1] %v11_v57  ;;  %v4528_v59 = vld [vmem:[#allocation48_spill] sm:$0xff] }
 0x611   :  { %2199 = vmatpush1.msra.mxu1 %v2119_v63  ;;  %2129 = vmatprep.subr.mxu0 %v2114_v5 }
 0x612   :  { %2200 = vmatprep.subr.mxu1 %v2116_v58  ;;  %2130 = vmatpush1.msra.mxu0 %v2113_v55  ;;  %v4529_v58 = vld [vmem:[#allocation50_spill] sm:$0xff] }
 0x613   :  { %2201 = vmatpush1.msra.mxu1 %v2115_v3  ;;  %2131 = vmatprep.subr.mxu0 %v2110_v33 }
 0x614   :  { %2202 = vmatprep.subr.mxu1 %v2112_v54  ;;  %2132 = vmatpush1.msra.mxu0 %v2109_v0  ;;  %v4530_v0 = vld [vmem:[#allocation51_spill] sm:$0xff] }
 0x615   :  { %2203 = vmatpush1.msra.mxu1 %v2111_v62  ;;  %2133 = vmatprep.subr.mxu0 %v2106_v4  ;;  %v4531_v4 = vld [vmem:[#allocation49_spill] sm:$0xff] }
 0x616   :  { %2204 = vmatprep.subr.mxu1 %v2108_v10  ;;  %2134 = vmatpush1.msra.mxu0 %v2105_v11 }
 0x617   :  { %2205 = vmatpush1.msra.mxu1 %v2107_v60  ;;  %2135 = vmatprep.subr.mxu0 %v2102_v8 }
 0x618   :  { %2206 = vmatprep.subr.mxu1 %v2104_v9  ;;  %2136 = vmatpush1.msra.mxu0 %v2101_v6 }
 0x619   :  { %2207 = vmatpush1.msra.mxu1 %v2103_v12  ;;  %2137 = vmatprep.subr.mxu0 %v2098_v13 }
 0x61a   :  { %2208 = vmatprep.subr.mxu1 %v2100_v14  ;;  %2138 = vmatpush1.msra.mxu0 %v2097_v15 }
 0x61b   :  { %2209 = vmatpush1.msra.mxu1 %v2099_v16  ;;  %2139 = vmatprep.subr.mxu0 %v2094_v17 }
 0x61c   :  { %2210 = vmatprep.subr.mxu1 %v2096_v19  ;;  %2140 = vmatpush1.msra.mxu0 %v2093_v20 }
 0x61d   :  { %2211 = vmatpush1.msra.mxu1 %v2095_v21  ;;  %2141 = vmatprep.subr.mxu0 %v2090_v22 }
 0x61e   :  { %2212 = vmatprep.subr.mxu1 %v2092_v23  ;;  %2142 = vmatpush1.msra.mxu0 %v2089_v24 }
 0x61f   :  { %2213 = vmatpush1.msra.mxu1 %v2091_v25  ;;  %2143 = vmatprep.subr.mxu0 %v2086_v26  ;;  %v2515_v25 = vld [vmem:[#allocation6] ss:$0 sm:$0xff] }
 0x620   :  { %2214 = vmatprep.subr.mxu1 %v2088_v28  ;;  %2144 = vmatpush1.msra.mxu0 %v2085_v29  ;;  %v4532_v28 = vld [vmem:[#allocation52_spill] sm:$0xff] }
 0x621   :  { %2215 = vmatpush1.msra.mxu1 %v2087_v30  ;;  %2145 = vmatprep.subr.mxu0 %v2082_v31 }
 0x622   :  { %2216 = vmatprep.subr.mxu1 %v2084_v32  ;;  %2146 = vmatpush1.msra.mxu0 %v2081_v34  ;;  %v4533_v32 = vld [vmem:[#allocation54_spill] sm:$0xff] }
 0x623   :  { %2217 = vmatpush1.msra.mxu1 %v2083_v35  ;;  %2147 = vmatprep.subr.mxu0 %v2078_v37 }
 0x624   :  { %2218 = vmatprep.subr.mxu1 %v2080_v38  ;;  %2148 = vmatpush1.msra.mxu0 %v2077_v39  ;;  %v4534_v38 = vld [vmem:[#allocation55_spill] sm:$0xff] }
 0x625   :  { %2219 = vmatpush1.msra.mxu1 %v2079_v40  ;;  %2149 = vmatprep.subr.mxu0 %v2074_v41  ;;  %v4535_v40 = vld [vmem:[#allocation53_spill] sm:$0xff] }
 0x626   :  { %2220 = vmatprep.subr.mxu1 %v2076_v42  ;;  %2150 = vmatpush1.msra.mxu0 %v2073_v43 }
 0x627   :  { %2221 = vmatpush1.msra.mxu1 %v2075_v44  ;;  %2151 = vmatprep.subr.mxu0 %v2070_v46 }
 0x628   :  { %2222 = vmatprep.subr.mxu1 %v2072_v47  ;;  %2152 = vmatpush1.msra.mxu0 %v2069_v48 }
 0x629   :  { %2223 = vmatpush1.msra.mxu1 %v2071_v49  ;;  %2153 = vmatprep.subr.mxu0 %v2066_v50 }
 0x62a   :  { %2224 = vmatprep.subr.mxu1 %v2068_v51  ;;  %2154 = vmatpush1.msra.mxu0 %v2065_v52 }
 0x62b   :  { %2225 = vmatpush1.msra.mxu1 %v2067_v7  ;;  %2155 = vmatprep.subr.mxu0 %v2062_v45 }
 0x62c   :  { %2226 = vmatprep.subr.mxu1 %v2064_v2  ;;  %2156 = vmatpush1.msra.mxu0 %v2061_v36 }
 0x62d   :  { %2227 = vmatpush1.msra.mxu1 %v2063_v27  ;;  %2526 = vset.pattern.permute.xlu0 %v2689_v1 }
 0x6cc   :  { %v1948_v56 = vpop.f32.mrf.mxu0  ;;  %v2019_v3 = vpop.f32.mrf.mxu1 }
 0x6cd   :  { %v2024_v53 = vadd.f32 %v1948_v56, %v4528_v59  ;;  %v2026_v10 = vadd.f32 %v2019_v3, %v4531_v4  ;;  %v2323_v56 = vpop.xlane.xlu0 %2322  ;;  %v2327_v3 = vpop.xlane.xlu1 %2326 }
 0x6ce   :  { %v1950_v63 = vpop.f32.mrf.mxu0  ;;  %v2021_v54 = vpop.f32.mrf.mxu1 }
 0x6cf   :  { %v2508_v5 = vmul.f32 -1.442695, %v2024_v53  ;;  %v2025_v55 = vadd.f32 %v1950_v63, %v4529_v58  ;;  %v2027_v62 = vadd.f32 %v2021_v54, %v4530_v0 }
 0x6d1   :  { %2623 = vpow2.f32 %v2508_v5  ;;  %v2509_v33 = vmul.f32 -1.442695, %v2025_v55  ;;  %v2510_v11 = vmul.f32 -1.442695, %v2027_v62  ;;  %v2325_v59 = vpop.xlane.xlu0 %2324  ;;  %v2329_v62 = vpop.xlane.xlu1 %2328 }
 0x6d3   :  { %2625 = vpow2.f32 %v2509_v33 }
 0x6d4   :  { %2627 = vtanh.f32 %v2026_v10 }
 0x6d5   :  { %2629 = vpow2.f32 %v2510_v11  ;;  %v2331_v53 = vpop.xlane.xlu0 %2330 }
 0x6de   :  { %v2624_v60 = vpop.eup %2623 }
 0x6df   :  { %v2031_v8 = vadd.f32 1.0, %v2624_v60  ;;  %v2333_v60 = vpop.xlane.xlu1 %2332 }
 0x6e0   :  { %v2626_v9 = vpop.eup %2625 }
 0x6e1   :  { %2631 = vrcp.f32 %v2031_v8  ;;  %v2037_v6 = vadd.f32 1.0, %v2626_v9  ;;  %v2628_v12 = vpop.eup %2627 }
 0x6e2   :  { %v2630_v13 = vpop.eup %2629 }
 0x6e3   :  { %2633 = vrcp.f32 %v2037_v6  ;;  %v2044_v17 = vadd.f32 1.0, %v2630_v13 }
 0x6e5   :  { %2635 = vrcp.f32 %v2044_v17 }
 0x6ee   :  { %v2632_v14 = vpop.eup %2631 }
 0x6ef   :  { %v2048_v15 = vmul.f32 %v2632_v14, %v2628_v12 }
 0x6f0   :  { %v2634_v16 = vpop.eup %2633 }
 0x6f1   :  { %v2047_v19 = vmul.f32 %v2634_v16, %v4057_v61 }
 0x6f2   :  { %v2636_v21 = vpop.eup %2635 }
 0x6f3   :  { %v2049_v20 = vadd.f32 %v2048_v15, %v2047_v19 }
 0x6f5   :  { %2637 = vtanh.f32 %v2049_v20 }
 0x702   :  { %v2638_v22 = vpop.eup %2637 }
 0x703   :  { %v2051_v23 = vmul.f32 %v2638_v22, %v2636_v21 }
 0x705   :  { %2190 = vmatmul.mubr.f32.vlgmr.msra.gmra.mxu0 %v2051_v23  ;;  %2261 = vmatmul.mubr.f32.vlgmr.msra.gmra.mxu1 %v2051_v23  ;;  %v2320_v24 = vmul.f32 %v4063_v18, %v2051_v23 }
 0x707   :  { %2334 = vadd.xlane.f32.xlu0 %v2320_v24 }
 0x71d   :  { %2345 = vperm.xlu0 %2526, %v2515_v25  }
 0x790   :  { %v2335_v63 = vpop.xlane.xlu0 %2334 }
 0x798   :  { %v2346_v5 = vpop.permute.xlu0 %2345 }
 0x799   :  { %v2348_v58 = vadd.f32 %v2346_v5, %v2323_v56  ;;  %v2349_v55 = vadd.f32 %v2346_v5, %v2325_v59  ;;  %v2350_v33 = vadd.f32 %v2346_v5, %v2327_v3  ;;  %v2351_v10 = vadd.f32 %v2346_v5, %v2329_v62 }
 0x79a   :  { %v2352_v11 = vadd.f32 %v2346_v5, %v2331_v53  ;;  %v2353_v8 = vadd.f32 %v2346_v5, %v2333_v60  ;;  %v2354_v6 = vadd.f32 %v2346_v5, %v2335_v63 }
 0x79b   :  { %v2516_v54 = vmul.f32 -1.442695, %v2348_v58  ;;  %v2517_v0 = vmul.f32 -1.442695, %v2349_v55  ;;  %v2518_v4 = vmul.f32 -1.442695, %v2350_v33 }
 0x79c   :  { %v2520_v9 = vmul.f32 -1.442695, %v2352_v11  ;;  %v2521_v12 = vmul.f32 -1.442695, %v2353_v8  ;;  %v2522_v15 = vmul.f32 -1.442695, %v2354_v6 }
 0x7c5   :  { %v2191_v26 = vpop.f32.mrf.mxu0  ;;  %v2262_v34 = vpop.f32.mrf.mxu1 }
 0x7c6   :  { %v2267_v29 = vadd.f32 %v2191_v26, %v4532_v28  ;;  %v2269_v41 = vadd.f32 %v2262_v34, %v4535_v40 }
 0x7c7   :  { %v2193_v30 = vpop.f32.mrf.mxu0  ;;  %v2264_v37 = vpop.f32.mrf.mxu1 }
 0x7c8   :  { %v2511_v31 = vmul.f32 -1.442695, %v2267_v29  ;;  %v2268_v61 = vadd.f32 %v2193_v30, %v4533_v32  ;;  %v2270_v39 = vadd.f32 %v2264_v37, %v4534_v38  ;;  %v4536_v30 = vlaneseq }
 0x7ca   :  { %2639 = vpow2.f32 %v2511_v31  ;;  %v2512_v35 = vmul.f32 -1.442695, %v2268_v61  ;;  %v2513_v42 = vmul.f32 -1.442695, %v2270_v39  ;;  %v2413_v31 = vand.u32 127, %v4536_v30 }
 0x7cc   :  { %2641 = vpow2.f32 %v2512_v35  ;;  %v4537_v35 = vld [vmem:[#allocation27_spill] sm:$0xff] }
 0x7cd   :  { %2643 = vtanh.f32 %v2269_v41  ;;  %v2416_v37 = vsub.s32 %v2413_v31, %v4537_v35 }
 0x7ce   :  { %2645 = vpow2.f32 %v2513_v42 }
 0x7d7   :  { %v2640_v43 = vpop.eup %2639 }
 0x7d8   :  { %v2274_v44 = vadd.f32 1.0, %v2640_v43 }
 0x7d9   :  { %v2642_v46 = vpop.eup %2641 }
 0x7da   :  { %2647 = vrcp.f32 %v2274_v44  ;;  %v2280_v47 = vadd.f32 1.0, %v2642_v46  ;;  %v2644_v48 = vpop.eup %2643 }
 0x7db   :  { %v2646_v49 = vpop.eup %2645 }
 0x7dc   :  { %2649 = vrcp.f32 %v2280_v47  ;;  %v2287_v7 = vadd.f32 1.0, %v2646_v49 }
 0x7de   :  { %2651 = vrcp.f32 %v2287_v7 }
 0x7e7   :  { %v2648_v50 = vpop.eup %2647 }
 0x7e8   :  { %v2291_v51 = vmul.f32 %v2648_v50, %v2644_v48 }
 0x7e9   :  { %v2650_v52 = vpop.eup %2649 }
 0x7ea   :  { %v2290_v45 = vmul.f32 %v2650_v52, %v2049_v20 }
 0x7eb   :  { %v2652_v36 = vpop.eup %2651 }
 0x7ec   :  { %v2292_v2 = vadd.f32 %v2291_v51, %v2290_v45 }
 0x7ee   :  { %2653 = vtanh.f32 %v2292_v2 }
 0x7ef   :  { %2655 = vpow2.f32 %v2516_v54 }
 0x7f0   :  { %2657 = vpow2.f32 %v2517_v0 }
 0x7f1   :  { %2659 = vpow2.f32 %v2518_v4 }
 0x7fb   :  { %v2654_v27 = vpop.eup %2653 }
 0x7fc   :  { %v2294_v1 = vmul.f32 %v2654_v27, %v2652_v36  ;;  %v2656_v13 = vpop.eup %2655 }
 0x7fd   :  { %v2658_v14 = vpop.eup %2657  ;;  %v2380_v16 = vadd.f32 1.0, %v2656_v13 }
 0x7fe   :  { %v2321_v57 = vmul.f32 %v4063_v18, %v2294_v1  ;;  %v2519_v18 = vmul.f32 -1.442695, %v2351_v10  ;;  %v2660_v17 = vpop.eup %2659  ;;  %v2381_v19 = vadd.f32 1.0, %v2658_v14 }
 0x7ff   :  { %v2382_v20 = vadd.f32 1.0, %v2660_v17 }
 0x800   :  { %2336 = vadd.xlane.f32.xlu1 %v2321_v57  ;;  %2661 = vpow2.f32 %v2519_v18 }
 0x801   :  { %2663 = vpow2.f32 %v2520_v9 }
 0x802   :  { %2665 = vpow2.f32 %v2521_v12 }
 0x803   :  { %2667 = vpow2.f32 %v2522_v15 }
 0x804   :  { %2669 = vrcp.f32 %v2380_v16 }
 0x805   :  { %2671 = vrcp.f32 %v2381_v19 }
 0x806   :  { %2673 = vrcp.f32 %v2382_v20 }
 0x80d   :  { %v2662_v23 = vpop.eup %2661 }
 0x80e   :  { %v2664_v25 = vpop.eup %2663  ;;  %v2383_v26 = vadd.f32 1.0, %v2662_v23 }
 0x80f   :  { %v2666_v28 = vpop.eup %2665  ;;  %v2384_v29 = vadd.f32 1.0, %v2664_v25 }
 0x810   :  { %v2668_v32 = vpop.eup %2667  ;;  %v2385_v61 = vadd.f32 1.0, %v2666_v28 }
 0x811   :  { %v2670_v34 = vpop.eup %2669  ;;  %v2386_v39 = vadd.f32 1.0, %v2668_v32 }
 0x812   :  { %v2672_v38 = vpop.eup %2671  ;;  %v2417_v41 = vrot.slane %v2670_v34, %v2416_v37 }
 0x813   :  { %v2674_v40 = vpop.eup %2673  ;;  %v2421_v42 = vrot.slane %v2672_v38, %v2416_v37 }
 0x814   :  { %v2425_v46 = vrot.slane %v2674_v40, %v2416_v37 }
 0x815   :  { %v2447_v47 = vsel %vm2446_vm1, %v2421_v42, %v2417_v41 }
 0x816   :  { %v2449_v49 = vsel %vm2448_vm2, %v2425_v46, %v2447_v47 }
 0x889   :  { %v2337_v21 = vpop.xlane.xlu1 %2336 }
 0x88a   :  { %v2355_v22 = vadd.f32 %v2346_v5, %v2337_v21 }
 0x88c   :  { %v2523_v24 = vmul.f32 -1.442695, %v2355_v22 }
 0x88e   :  { %2675 = vpow2.f32 %v2523_v24 }
 0x88f   :  { %2677 = vrcp.f32 %v2383_v26 }
 0x890   :  { %2679 = vrcp.f32 %v2384_v29 }
 0x891   :  { %2681 = vrcp.f32 %v2385_v61 }
 0x892   :  { %2683 = vrcp.f32 %v2386_v39 }
 0x89b   :  { %v2676_v43 = vpop.eup %2675 }
 0x89c   :  { %v2387_v44 = vadd.f32 1.0, %v2676_v43  ;;  %v2678_v48 = vpop.eup %2677 }
 0x89d   :  { %v2680_v50 = vpop.eup %2679  ;;  %v2429_v51 = vrot.slane %v2678_v48, %v2416_v37 }
 0x89e   :  { %2685 = vrcp.f32 %v2387_v44  ;;  %v2682_v7 = vpop.eup %2681  ;;  %v2433_v45 = vrot.slane %v2680_v50, %v2416_v37 }
 0x89f   :  { %v2451_v52 = vsel %vm2450_vm3, %v2429_v51, %v2449_v49  ;;  %v2684_v36 = vpop.eup %2683  ;;  %v2437_v27 = vrot.slane %v2682_v7, %v2416_v37 }
 0x8a0   :  { %v2453_v2 = vsel %vm2452_vm4, %v2433_v45, %v2451_v52  ;;  %v2441_v56 = vrot.slane %v2684_v36, %v2416_v37 }
 0x8a1   :  { %v2455_v1 = vsel %vm2454_vm5, %v2437_v27, %v2453_v2 }
 0x8a2   :  { %v2457_v53 = vsel %vm2456_vm6, %v2441_v56, %v2455_v1 }
 0x8ab   :  { %v2686_v57 = vpop.eup %2685 }
 0x8ac   :  { %v2445_v59 = vrot.slane %v2686_v57, %v2416_v37 }
 0x8ae   :  { %v2459_v63 = vsel %vm2458_vm7, %v2445_v59, %v2457_v53 }
 0x8af   :  { %2462 = vst.msk [vmem:[%s4285_s6] sm:$0xff] %vm2461_vm8, %v2459_v63 }

</bundles_post_ra>
